<compile_context>
chip_gen: v7x
topology: tpu7x:2x2x1
jax: 0.10.0
libtpu: 0.0.40
codegen_flags: <defaults>
</compile_context>

<pallas_src>
import functools
import math

import jax
import jax.numpy as jnp
from jax.experimental import pallas as pl
from jax.experimental.pallas import tpu as pltpu


# ----------------------------------------------------------------------------- helpers
def _layer_norm(x, w, b, eps=1e-5):
    mean = jnp.mean(x, axis=-1, keepdims=True)
    var = jnp.mean(jnp.square(x - mean), axis=-1, keepdims=True)
    return (x - mean) * jax.lax.rsqrt(var + eps) * w + b


def patchify(x_nchw, patch):
    """NCHW image -> (B, num_patches, C*P*P), patch feature order = (c, kh, kw)."""
    B, C, H, W = x_nchw.shape
    Gh, Gw = H // patch, W // patch
    x = x_nchw.reshape(B, C, Gh, patch, Gw, patch)
    x = x.transpose(0, 2, 4, 1, 3, 5)            # (B, Gh, Gw, C, P, P)
    return x.reshape(B, Gh * Gw, C * patch * patch)


# ----------------------------------------------------------------------------- fused kernel
def fused_vit_kernel(p_ref, wp_ref, bp_ref, pos_ref,
                     wqkv_ref, bqkv_ref, wo_ref, bo_ref,
                     ln1w_ref, ln1b_ref, w1_ref, b1_ref,
                     w2_ref, b2_ref, ln2w_ref, ln2b_ref,
                     o_ref, x_ref, *, num_heads, seq_valid):
    # p_ref : (bb, S_pad, Pd)  host-prepared patch slab (row 0 = cls slot, zeros)
    # x_ref : (bb, S_pad, E)   bf16 VMEM scratch, resident across the layer grid axis
    # per-layer weights arrive as (1, ...) blocks selected by the l grid index.
    l = pl.program_id(1)
    n_layers = pl.num_programs(1)
    bb, S, E = x_ref.shape
    H = num_heads
    Dh = E // H
    M = bb * S
    scale = 1.0 / math.sqrt(Dh)
    cdt = jnp.bfloat16          # MXU operand dtype; accumulation / stats stay f32

    # ---- patch embedding + positional/cls add: only on the first layer step --------
    @pl.when(l == 0)
    def _():
        patches = p_ref[...].reshape(M, p_ref.shape[-1]).astype(cdt)
        tok = jnp.dot(patches, wp_ref[...],
                      preferred_element_type=jnp.float32) + bp_ref[...]   # (M, E)
        tok = tok.reshape(bb, S, E) + pos_ref[...][None]                  # +pos (+cls fold)
        x_ref[...] = tok.astype(x_ref.dtype)
    # dropout = identity (eval mode)

    x_bf = x_ref[...]                       # (bb, S, E) bf16
    x2 = x_bf.reshape(M, E)

    # additive key-padding bias (static shapes: only emitted if S is actually padded)
    if seq_valid < S:
        kidx = jax.lax.broadcasted_iota(jnp.int32, (1, 1, S), 2)
        key_bias = jnp.where(kidx < seq_valid, 0.0, -1e30).astype(jnp.float32)
    else:
        key_bias = None

    # ---- multi-head self attention --------------------------------------------------
    qkv = jnp.dot(x2, wqkv_ref[0],
                  preferred_element_type=jnp.float32) + bqkv_ref[0]       # (M, 3E) f32
    qkv3 = qkv.reshape(bb, S, 3 * E)
    q_all = qkv3[:, :, :E].astype(cdt)          # aligned coarse slices, then bf16
    k_all = qkv3[:, :, E:2 * E].astype(cdt)
    v_all = qkv3[:, :, 2 * E:].astype(cdt)

    heads = []
    for h in range(H):                          # static unroll; H is small
        q = q_all[:, :, h * Dh:(h + 1) * Dh]
        k = k_all[:, :, h * Dh:(h + 1) * Dh]
        v = v_all[:, :, h * Dh:(h + 1) * Dh]
        # bf16 operands, f32 accumulation; contraction on the feature axis (no k.T)
        s = jnp.einsum("bqd,bkd->bqk", q, k,
                       preferred_element_type=jnp.float32) * scale        # (bb, S, S)
        if key_bias is not None:
            s = s + key_bias
        s = s - jnp.max(s, axis=-1, keepdims=True)
        p = jnp.exp(s)
        p = p * pl.reciprocal(jnp.sum(p, axis=-1, keepdims=True), approx=True)
        o_h = jnp.einsum("bqk,bkd->bqd", p.astype(cdt), v,
                         preferred_element_type=jnp.float32)              # (bb, S, Dh)
        heads.append(o_h.astype(cdt))

    # one full-K output projection instead of H small-K (Dh) matmuls
    attn = jnp.concatenate(heads, axis=-1).reshape(M, E)                  # (M, E) bf16
    attn = jnp.dot(attn, wo_ref[0],
                   preferred_element_type=jnp.float32) + bo_ref[0]        # (M, E) f32

    x1 = _layer_norm(x2.astype(jnp.float32) + attn, ln1w_ref[0], ln1b_ref[0])  # norm1

    # ---- feed-forward (ReLU) ---------------------------------------------------------
    hdn = jnp.dot(x1.astype(cdt), w1_ref[0],
                  preferred_element_type=jnp.float32) + b1_ref[0]
    hdn = jnp.maximum(hdn, 0.0).astype(cdt)                               # bf16 hidden
    ff = jnp.dot(hdn, w2_ref[0],
                 preferred_element_type=jnp.float32) + b2_ref[0]

    xo = _layer_norm(x1 + ff, ln2w_ref[0], ln2b_ref[0])                   # norm2, f32

    x_ref[...] = xo.reshape(bb, S, E).astype(x_ref.dtype)                 # bf16 resident

    @pl.when(l == n_layers - 1)
    def _():
        o_ref[...] = xo.reshape(bb, S, E).astype(o_ref.dtype)


# ----------------------------------------------------------------------------- wrapper
def transformer_block_forward(x_nchw, params, patch_size, num_heads, *, batch_blocks=None):
    patches = patchify(x_nchw, patch_size).astype(jnp.float32)            # (B, N, Pd)
    B, N, Pd = patches.shape
    S, E = params["pos"].shape
    L = len(params["layers"])
    F = params["layers"][0]["w1"].shape[1]
    H = num_heads
    S_pad = ((S + 7) // 8) * 8                 # sublane-aligned sequence length

    # ---- host-side packing: patch slab with a cls slot + padded rows ----------------
    # row 0 is zeros -> proj row 0 = b_patch; pos_eff row 0 adds (cls - b_patch + pos[0])
    # so the kernel's single matmul+add yields the cls token too (no in-kernel concat).
    slab = jnp.zeros((B, S_pad, Pd), jnp.float32)
    slab = slab.at[:, 1:N + 1, :].set(patches)
    b_patch = params["b_patch"].reshape(1, E)
    pos_eff = jnp.zeros((S_pad, E), jnp.float32)
    pos_eff = pos_eff.at[:S, :].set(params["pos"])
    pos_eff = pos_eff.at[0, :].add(params["cls"].reshape(E) - b_patch.reshape(E))
    pos_eff = pos_eff.at[S:, :].add(-b_patch.reshape(E))    # keep padded rows at zero

    # ---- batch-block selection: 1 on single-TC chips, 2 (megacore) on v7x -----------
    if batch_blocks is None:
        dk = jax.devices()[0].device_kind.lower()
        multi_tc = ("v7" in dk) or ("7x" in dk)
        batch_blocks = 2 if (multi_tc and B % 2 == 0) else 1
    if B % batch_blocks != 0:
        batch_blocks = 1
    # crude VMEM budget: keep the largest f32 intermediate (M, max(F,3E)) small
    act_budget = 12 * 1024 * 1024
    while ((B // batch_blocks) * S_pad * max(F, 3 * E) * 4 > act_budget
           and batch_blocks < B and B % (batch_blocks * 2) == 0):
        batch_blocks *= 2
    bb = B // batch_blocks

    # ---- weights: stack per-layer, matmul operands -> bf16 --------------------------
    bf16 = jnp.bfloat16
    stack = lambda name: jnp.stack([lp[name] for lp in params["layers"]])
    wp = params["w_patch"].astype(bf16)                       # (Pd, E)
    wqkv = stack("wqkv").astype(bf16)                         # (L, E, 3E)
    wo = stack("wo").astype(bf16)                             # (L, E, E)
    w1 = stack("w1").astype(bf16)                             # (L, E, F)
    w2 = stack("w2").astype(bf16)                             # (L, F, E)
    bqkv, bo = stack("bqkv"), stack("bo")
    b1, b2 = stack("b1"), stack("b2")
    ln1w, ln1b = stack("ln1w"), stack("ln1b")
    ln2w, ln2b = stack("ln2w"), stack("ln2b")

    def inv(*shape):                           # grid-invariant full-array block
        return pl.BlockSpec(shape, lambda i, l, _n=len(shape): (0,) * _n)

    def per_layer(*tail):                      # (1, ...) block selected by the l axis
        return pl.BlockSpec((1,) + tail, lambda i, l, _n=len(tail): (l,) + (0,) * _n)

    flops = 2 * B * (S_pad * Pd * E
                     + L * (S_pad * E * 3 * E + 2 * H * S_pad * S_pad * (E // H)
                            + S_pad * E * E + 2 * S_pad * E * F))
    bytes_accessed = int(slab.size * 4 + B * S_pad * E * 4
                         + batch_blocks * 2 * (wqkv.size + wo.size + w1.size + w2.size)
                         + 2 * wp.size
                         + 4 * batch_blocks * (bqkv.size + bo.size + b1.size + b2.size
                                               + ln1w.size + ln1b.size + ln2w.size + ln2b.size)
                         + 4 * (pos_eff.size + b_patch.size))
    cost = pl.CostEstimate(flops=int(flops),
                           transcendentals=int(B * L * H * S_pad * S_pad),
                           bytes_accessed=bytes_accessed)

    # TODO(synk): for very large E/F, additionally tile wqkv/w1/w2 over output columns
    # so a single layer's weight block also respects the per-core VMEM budget.
    out = pl.pallas_call(
        functools.partial(fused_vit_kernel, num_heads=H, seq_valid=S),
        out_shape=jax.ShapeDtypeStruct((B, S_pad, E), jnp.float32),
        grid=(batch_blocks, L),
        in_specs=[
            pl.BlockSpec((bb, S_pad, Pd), lambda i, l: (i, 0, 0)),
            inv(Pd, E), inv(1, E), inv(S_pad, E),
            per_layer(E, 3 * E), per_layer(1, 3 * E),
            per_layer(E, E), per_layer(1, E),
            per_layer(1, E), per_layer(1, E),
            per_layer(E, F), per_layer(1, F),
            per_layer(F, E), per_layer(1, E),
            per_layer(1, E), per_layer(1, E),
        ],
        out_specs=pl.BlockSpec((bb, S_pad, E), lambda i, l: (i, 0, 0)),
        scratch_shapes=[pltpu.VMEM((bb, S_pad, E), jnp.bfloat16)],
        compiler_params=pltpu.CompilerParams(
            dimension_semantics=("parallel", "arbitrary"),
            vmem_limit_bytes=48 * 1024 * 1024),
        cost_estimate=cost,
    )(slab, wp, b_patch, pos_eff,
      wqkv, bqkv, wo, bo, ln1w, ln1b, w1, b1, w2, b2, ln2w, ln2b)

    return out[:, :S, :]                        # crop padded sequence rows


# ----------------------------------------------------------------------------- params
def init_params(key, C, P, E, H, S, L):
    Pd = C * P * P
    F = 4 * E
    keys = jax.random.split(key, 4 + L)
    f32 = jnp.float32
    p = {
        "w_patch": jax.random.normal(keys[0], (Pd, E), f32) * 0.02,
        "b_patch": jax.random.normal(keys[1], (1, E), f32) * 0.02,
        "cls":     jax.random.normal(keys[2], (1, E), f32) * 0.02,
        "pos":     jax.random.normal(keys[3], (S, E), f32) * 0.02,
        "layers": [],
    }
    for l in range(L):
        lk = jax.random.split(keys[4 + l], 4)
        p["layers"].append(dict(
            wqkv=jax.random.normal(lk[0], (E, 3 * E), f32) * 0.05,
            bqkv=jnp.zeros((1, 3 * E), f32),
            wo=jax.random.normal(lk[1], (E, E), f32) * 0.05,
            bo=jnp.zeros((1, E), f32),
            ln1w=jnp.ones((1, E), f32), ln1b=jnp.zeros((1, E), f32),
            w1=jax.random.normal(lk[2], (E, F), f32) * 0.05,
            b1=jnp.zeros((1, F), f32),
            w2=jax.random.normal(lk[3], (F, E), f32) * 0.05,
            b2=jnp.zeros((1, E), f32),
            ln2w=jnp.ones((1, E), f32), ln2b=jnp.zeros((1, E), f32),
        ))
    return p


# ----------------------------------------------------------------------------- reference (pure f32 JAX)
def ref_forward(x_nchw, params, patch_size, num_heads):
    B = x_nchw.shape[0]
    patches = patchify(x_nchw, patch_size)
    proj = patches @ params["w_patch"] + params["b_patch"]
    S, E = params["pos"].shape
    cls = jnp.broadcast_to(params["cls"][None], (B, 1, E))
    x = jnp.concatenate([cls, proj], axis=1) + params["pos"][None]
    H = num_heads
    Dh = E // H
    for lp in params["layers"]:
        qkv = x @ lp["wqkv"] + lp["bqkv"]
        q, k, v = qkv[..., :E], qkv[..., E:2 * E], qkv[..., 2 * E:]
        q = q.reshape(B, S, H, Dh).transpose(0, 2, 1, 3)
        k = k.reshape(B, S, H, Dh).transpose(0, 2, 1, 3)
        v = v.reshape(B, S, H, Dh).transpose(0, 2, 1, 3)
        s = jnp.einsum("bhqd,bhkd->bhqk", q, k) / math.sqrt(Dh)
        a = jax.nn.softmax(s, axis=-1)
        o = jnp.einsum("bhqk,bhkd->bhqd", a, v).transpose(0, 2, 1, 3).reshape(B, S, E)
        o = o @ lp["wo"] + lp["bo"]
        x = _layer_norm(x + o, lp["ln1w"], lp["ln1b"])
        hdn = jax.nn.relu(x @ lp["w1"] + lp["b1"])
        ff = hdn @ lp["w2"] + lp["b2"]
        x = _layer_norm(x + ff, lp["ln2w"], lp["ln2b"])
    return x


# ----------------------------------------------------------------------------- main
if __name__ == "__main__":
    # small shapes consistent with the module: img=16, patch=4, C=1, E=32, 4 heads, 2 layers
    B, C, IMG, P = 2, 1, 16, 4
    E, H, L = 32, 4, 2
    N = (IMG // P) ** 2
    S = N + 1

    key = jax.random.PRNGKey(0)
    kx, kp = jax.random.split(key)
    x = jax.random.normal(kx, (B, C, IMG, IMG), jnp.float32)
    params = init_params(kp, C, P, E, H, S, L)

    out = transformer_block_forward(x, params, P, H)
    out = jax.block_until_ready(out)

    ref = ref_forward(x, params, P, H)
    assert out.shape == (B, S, E), out.shape
    # bf16 matmul operands + bf16-resident activations + approx-reciprocal softmax
    # vs a pure-f32 reference -> loose tolerance
    err = float(jnp.max(jnp.abs(out - ref)))
    assert err < 5e-2, err
    print("KERNEL_OK")
</pallas_src>

<mosaic_0001>
module attributes {stable_mosaic.version = 11 : i64} {
  func.func @fused_vit_kernel(%arg0: i32, %arg1: i32, %arg2: memref<2x24x16xf32, #tpu.memory_space<vmem>>, %arg3: memref<16x32xbf16, #tpu.memory_space<vmem>>, %arg4: memref<1x32xf32, #tpu.memory_space<vmem>>, %arg5: memref<24x32xf32, #tpu.memory_space<vmem>>, %arg6: memref<1x32x96xbf16, #tpu.memory_space<vmem>>, %arg7: memref<1x1x96xf32, #tpu.memory_space<vmem>>, %arg8: memref<1x32x32xbf16, #tpu.memory_space<vmem>>, %arg9: memref<1x1x32xf32, #tpu.memory_space<vmem>>, %arg10: memref<1x1x32xf32, #tpu.memory_space<vmem>>, %arg11: memref<1x1x32xf32, #tpu.memory_space<vmem>>, %arg12: memref<1x32x128xbf16, #tpu.memory_space<vmem>>, %arg13: memref<1x1x128xf32, #tpu.memory_space<vmem>>, %arg14: memref<1x128x32xbf16, #tpu.memory_space<vmem>>, %arg15: memref<1x1x32xf32, #tpu.memory_space<vmem>>, %arg16: memref<1x1x32xf32, #tpu.memory_space<vmem>>, %arg17: memref<1x1x32xf32, #tpu.memory_space<vmem>>, %arg18: memref<2x24x32xf32, #tpu.memory_space<vmem>>, %arg19: memref<2x24x32xbf16, #tpu.memory_space<vmem>>) attributes {dimension_semantics = [#tpu.dimension_semantics<parallel>, #tpu.dimension_semantics<arbitrary>], iteration_bounds = array<i64: 1, 2>, scalar_prefetch = 0 : i64, scratch_operands = 1 : i64, tpu.core_type = #tpu.core_type<tc>, window_params = [{transform_indices = @transform_0, window_bounds = array<i64: 2, 24, 16>}, {pipeline_mode = #tpu.pipeline_mode<synchronous>, transform_indices = @transform_1, window_bounds = array<i64: 16, 32>}, {pipeline_mode = #tpu.pipeline_mode<synchronous>, transform_indices = @transform_2, window_bounds = array<i64: 1, 32>}, {pipeline_mode = #tpu.pipeline_mode<synchronous>, transform_indices = @transform_3, window_bounds = array<i64: 24, 32>}, {transform_indices = @transform_4, window_bounds = array<i64: 1, 32, 96>}, {transform_indices = @transform_5, window_bounds = array<i64: 1, 1, 96>}, {transform_indices = @transform_6, window_bounds = array<i64: 1, 32, 32>}, {transform_indices = @transform_7, window_bounds = array<i64: 1, 1, 32>}, {transform_indices = @transform_8, window_bounds = array<i64: 1, 1, 32>}, {transform_indices = @transform_9, window_bounds = array<i64: 1, 1, 32>}, {transform_indices = @transform_10, window_bounds = array<i64: 1, 32, 128>}, {transform_indices = @transform_11, window_bounds = array<i64: 1, 1, 128>}, {transform_indices = @transform_12, window_bounds = array<i64: 1, 128, 32>}, {transform_indices = @transform_13, window_bounds = array<i64: 1, 1, 32>}, {transform_indices = @transform_14, window_bounds = array<i64: 1, 1, 32>}, {transform_indices = @transform_15, window_bounds = array<i64: 1, 1, 32>}, {transform_indices = @transform_16, window_bounds = array<i64: 2, 24, 32>}]} {
    %c0_i32 = arith.constant 0 : i32
    %0 = arith.cmpi eq, %arg1, %c0_i32 : i32
    %1 = arith.extui %0 : i1 to i32
    %c0_i32_0 = arith.constant 0 : i32
    %2 = arith.cmpi ne, %1, %c0_i32_0 : i32
    scf.if %2 {
      %c0_79 = arith.constant 0 : index
      %c0_80 = arith.constant 0 : index
      %c0_81 = arith.constant 0 : index
      %197 = vector.load %arg2[%c0_79, %c0_80, %c0_81] : memref<2x24x16xf32, #tpu.memory_space<vmem>>, vector<2x24x16xf32>
      %198 = vector.shape_cast %197 : vector<2x24x16xf32> to vector<48x16xf32>
      %199 = arith.truncf %198 : vector<48x16xf32> to vector<48x16xbf16>
      %c0_82 = arith.constant 0 : index
      %c0_83 = arith.constant 0 : index
      %200 = vector.load %arg3[%c0_82, %c0_83] : memref<16x32xbf16, #tpu.memory_space<vmem>>, vector<16x32xbf16>
      %cst_84 = arith.constant dense<0.000000e+00> : vector<48x32xf32>
      %201 = tpu.matmul %199, %200, %cst_84 {dimension_numbers = #tpu.dot_dimension_numbers<[1], [0], [0], [1], [0, 0, 1, 1], [], []>} : vector<48x16xbf16>, vector<16x32xbf16>, vector<48x32xf32> -> vector<48x32xf32>
      %c0_85 = arith.constant 0 : index
      %c0_86 = arith.constant 0 : index
      %202 = vector.load %arg4[%c0_85, %c0_86] : memref<1x32xf32, #tpu.memory_space<vmem>>, vector<1x32xf32>
      %203 = vector.broadcast %202 : vector<1x32xf32> to vector<48x32xf32>
      %204 = arith.addf %201, %203 : vector<48x32xf32>
      %205 = vector.shape_cast %204 : vector<48x32xf32> to vector<2x24x32xf32>
      %c0_87 = arith.constant 0 : index
      %c0_88 = arith.constant 0 : index
      %206 = vector.load %arg5[%c0_87, %c0_88] : memref<24x32xf32, #tpu.memory_space<vmem>>, vector<24x32xf32>
      %207 = vector.shape_cast %206 : vector<24x32xf32> to vector<1x24x32xf32>
      %208 = vector.broadcast %207 : vector<1x24x32xf32> to vector<2x24x32xf32>
      %209 = arith.addf %205, %208 : vector<2x24x32xf32>
      %210 = arith.truncf %209 : vector<2x24x32xf32> to vector<2x24x32xbf16>
      %c0_89 = arith.constant 0 : index
      %c0_90 = arith.constant 0 : index
      %c0_91 = arith.constant 0 : index
      %211 = vector.load %arg19[%c0_89, %c0_90, %c0_91] : memref<2x24x32xbf16, #tpu.memory_space<vmem>>, vector<2x24x32xbf16>
      tpu.vector_store %arg19[%c0_89, %c0_90, %c0_91], %210 {strides = array<i32>} : memref<2x24x32xbf16, #tpu.memory_space<vmem>>, vector<2x24x32xbf16>,
    } else {
    }
    %c0 = arith.constant 0 : index
    %c0_1 = arith.constant 0 : index
    %c0_2 = arith.constant 0 : index
    %3 = vector.load %arg19[%c0, %c0_1, %c0_2] : memref<2x24x32xbf16, #tpu.memory_space<vmem>>, vector<2x24x32xbf16>
    %4 = vector.shape_cast %3 : vector<2x24x32xbf16> to vector<48x32xbf16>
    %5 = tpu.iota {dimensions = array<i32: 2>} : vector<1x1x24xi32>
    %c17_i32 = arith.constant 17 : i32
    %6 = vector.broadcast %c17_i32 : i32 to vector<1x1x24xi32>
    %7 = arith.cmpi slt, %5, %6 : vector<1x1x24xi32>
    %cst = arith.constant 0.000000e+00 : f32
    %cst_3 = arith.constant -1.000000e+30 : f32
    %8 = vector.broadcast %cst : f32 to vector<1x1x24xf32>
    %9 = vector.broadcast %cst_3 : f32 to vector<1x1x24xf32>
    %10 = arith.select %7, %8, %9 : vector<1x1x24xi1>, vector<1x1x24xf32>
    %c0_4 = arith.constant 0 : index
    %c0_5 = arith.constant 0 : index
    %c0_6 = arith.constant 0 : index
    %11 = vector.load %arg6[%c0_4, %c0_5, %c0_6] : memref<1x32x96xbf16, #tpu.memory_space<vmem>>, vector<1x32x96xbf16>
    %12 = vector.shape_cast %11 : vector<1x32x96xbf16> to vector<32x96xbf16>
    %cst_7 = arith.constant dense<0.000000e+00> : vector<48x96xf32>
    %13 = tpu.matmul %4, %12, %cst_7 {dimension_numbers = #tpu.dot_dimension_numbers<[1], [0], [0], [1], [0, 0, 1, 1], [], []>} : vector<48x32xbf16>, vector<32x96xbf16>, vector<48x96xf32> -> vector<48x96xf32>
    %c0_8 = arith.constant 0 : index
    %c0_9 = arith.constant 0 : index
    %c0_10 = arith.constant 0 : index
    %14 = vector.load %arg7[%c0_8, %c0_9, %c0_10] : memref<1x1x96xf32, #tpu.memory_space<vmem>>, vector<1x1x96xf32>
    %15 = vector.shape_cast %14 : vector<1x1x96xf32> to vector<1x96xf32>
    %16 = vector.broadcast %15 : vector<1x96xf32> to vector<48x96xf32>
    %17 = arith.addf %13, %16 : vector<48x96xf32>
    %18 = vector.shape_cast %17 : vector<48x96xf32> to vector<2x24x96xf32>
    %19 = vector.extract_strided_slice %18 {offsets = [0, 0, 0], sizes = [2, 24, 32], strides = [1, 1, 1]} : vector<2x24x96xf32> to vector<2x24x32xf32>
    %20 = arith.truncf %19 : vector<2x24x32xf32> to vector<2x24x32xbf16>
    %21 = vector.extract_strided_slice %18 {offsets = [0, 0, 32], sizes = [2, 24, 32], strides = [1, 1, 1]} : vector<2x24x96xf32> to vector<2x24x32xf32>
    %22 = arith.truncf %21 : vector<2x24x32xf32> to vector<2x24x32xbf16>
    %23 = vector.extract_strided_slice %18 {offsets = [0, 0, 64], sizes = [2, 24, 32], strides = [1, 1, 1]} : vector<2x24x96xf32> to vector<2x24x32xf32>
    %24 = arith.truncf %23 : vector<2x24x32xf32> to vector<2x24x32xbf16>
    %25 = vector.extract_strided_slice %20 {offsets = [0, 0, 0], sizes = [2, 24, 8], strides = [1, 1, 1]} : vector<2x24x32xbf16> to vector<2x24x8xbf16>
    %26 = vector.extract_strided_slice %22 {offsets = [0, 0, 0], sizes = [2, 24, 8], strides = [1, 1, 1]} : vector<2x24x32xbf16> to vector<2x24x8xbf16>
    %27 = vector.extract_strided_slice %24 {offsets = [0, 0, 0], sizes = [2, 24, 8], strides = [1, 1, 1]} : vector<2x24x32xbf16> to vector<2x24x8xbf16>
    "tpu.trace_start"() <{level = 10 : i32, message = "bqd,bkd->bqk"}> : () -> ()
    %cst_11 = arith.constant dense<0.000000e+00> : vector<2x24x24xf32>
    %28 = tpu.matmul %25, %26, %cst_11 {dimension_numbers = #tpu.dot_dimension_numbers<[2], [2], [1], [1], [0, 0, 0, 1, 1, 1], [0], [0]>} : vector<2x24x8xbf16>, vector<2x24x8xbf16>, vector<2x24x24xf32> -> vector<2x24x24xf32>
    "tpu.trace_stop"() : () -> ()
    %cst_12 = arith.constant 0.353553385 : f32
    %29 = vector.broadcast %cst_12 : f32 to vector<2x24x24xf32>
    %30 = arith.mulf %28, %29 : vector<2x24x24xf32>
    %31 = vector.broadcast %10 : vector<1x1x24xf32> to vector<2x24x24xf32>
    %32 = arith.addf %30, %31 : vector<2x24x24xf32>
    %cst_13 = arith.constant dense<0xFF800000> : vector<2x24xf32>
    %33 = vector.multi_reduction <maximumf>, %32, %cst_13 [2] : vector<2x24x24xf32> to vector<2x24xf32>
    %34 = vector.shape_cast %33 : vector<2x24xf32> to vector<2x24x1xf32>
    %35 = vector.broadcast %34 : vector<2x24x1xf32> to vector<2x24x24xf32>
    %36 = arith.subf %32, %35 : vector<2x24x24xf32>
    %37 = math.exp %36 : vector<2x24x24xf32>
    %cst_14 = arith.constant dense<0.000000e+00> : vector<2x24xf32>
    %38 = vector.multi_reduction <add>, %37, %cst_14 [2] : vector<2x24x24xf32> to vector<2x24xf32>
    %39 = vector.shape_cast %38 : vector<2x24xf32> to vector<2x24x1xf32>
    %40 = tpu.reciprocal %39 {approx = true} : vector<2x24x1xf32> -> vector<2x24x1xf32>
    %41 = vector.broadcast %40 : vector<2x24x1xf32> to vector<2x24x24xf32>
    %42 = arith.mulf %37, %41 : vector<2x24x24xf32>
    %43 = arith.truncf %42 : vector<2x24x24xf32> to vector<2x24x24xbf16>
    "tpu.trace_start"() <{level = 10 : i32, message = "bqk,bkd->bqd"}> : () -> ()
    %cst_15 = arith.constant dense<0.000000e+00> : vector<2x24x8xf32>
    %44 = tpu.matmul %43, %27, %cst_15 {dimension_numbers = #tpu.dot_dimension_numbers<[2], [1], [1], [2], [0, 0, 0, 1, 1, 2], [0], [0]>} : vector<2x24x24xbf16>, vector<2x24x8xbf16>, vector<2x24x8xf32> -> vector<2x24x8xf32>
    "tpu.trace_stop"() : () -> ()
    %45 = arith.truncf %44 : vector<2x24x8xf32> to vector<2x24x8xbf16>
    %46 = vector.extract_strided_slice %20 {offsets = [0, 0, 8], sizes = [2, 24, 8], strides = [1, 1, 1]} : vector<2x24x32xbf16> to vector<2x24x8xbf16>
    %47 = vector.extract_strided_slice %22 {offsets = [0, 0, 8], sizes = [2, 24, 8], strides = [1, 1, 1]} : vector<2x24x32xbf16> to vector<2x24x8xbf16>
    %48 = vector.extract_strided_slice %24 {offsets = [0, 0, 8], sizes = [2, 24, 8], strides = [1, 1, 1]} : vector<2x24x32xbf16> to vector<2x24x8xbf16>
    "tpu.trace_start"() <{level = 10 : i32, message = "bqd,bkd->bqk"}> : () -> ()
    %cst_16 = arith.constant dense<0.000000e+00> : vector<2x24x24xf32>
    %49 = tpu.matmul %46, %47, %cst_16 {dimension_numbers = #tpu.dot_dimension_numbers<[2], [2], [1], [1], [0, 0, 0, 1, 1, 1], [0], [0]>} : vector<2x24x8xbf16>, vector<2x24x8xbf16>, vector<2x24x24xf32> -> vector<2x24x24xf32>
    "tpu.trace_stop"() : () -> ()
    %cst_17 = arith.constant 0.353553385 : f32
    %50 = vector.broadcast %cst_17 : f32 to vector<2x24x24xf32>
    %51 = arith.mulf %49, %50 : vector<2x24x24xf32>
    %52 = vector.broadcast %10 : vector<1x1x24xf32> to vector<2x24x24xf32>
    %53 = arith.addf %51, %52 : vector<2x24x24xf32>
    %cst_18 = arith.constant dense<0xFF800000> : vector<2x24xf32>
    %54 = vector.multi_reduction <maximumf>, %53, %cst_18 [2] : vector<2x24x24xf32> to vector<2x24xf32>
    %55 = vector.shape_cast %54 : vector<2x24xf32> to vector<2x24x1xf32>
    %56 = vector.broadcast %55 : vector<2x24x1xf32> to vector<2x24x24xf32>
    %57 = arith.subf %53, %56 : vector<2x24x24xf32>
    %58 = math.exp %57 : vector<2x24x24xf32>
    %cst_19 = arith.constant dense<0.000000e+00> : vector<2x24xf32>
    %59 = vector.multi_reduction <add>, %58, %cst_19 [2] : vector<2x24x24xf32> to vector<2x24xf32>
    %60 = vector.shape_cast %59 : vector<2x24xf32> to vector<2x24x1xf32>
    %61 = tpu.reciprocal %60 {approx = true} : vector<2x24x1xf32> -> vector<2x24x1xf32>
    %62 = vector.broadcast %61 : vector<2x24x1xf32> to vector<2x24x24xf32>
    %63 = arith.mulf %58, %62 : vector<2x24x24xf32>
    %64 = arith.truncf %63 : vector<2x24x24xf32> to vector<2x24x24xbf16>
    "tpu.trace_start"() <{level = 10 : i32, message = "bqk,bkd->bqd"}> : () -> ()
    %cst_20 = arith.constant dense<0.000000e+00> : vector<2x24x8xf32>
    %65 = tpu.matmul %64, %48, %cst_20 {dimension_numbers = #tpu.dot_dimension_numbers<[2], [1], [1], [2], [0, 0, 0, 1, 1, 2], [0], [0]>} : vector<2x24x24xbf16>, vector<2x24x8xbf16>, vector<2x24x8xf32> -> vector<2x24x8xf32>
    "tpu.trace_stop"() : () -> ()
    %66 = arith.truncf %65 : vector<2x24x8xf32> to vector<2x24x8xbf16>
    %67 = vector.extract_strided_slice %20 {offsets = [0, 0, 16], sizes = [2, 24, 8], strides = [1, 1, 1]} : vector<2x24x32xbf16> to vector<2x24x8xbf16>
    %68 = vector.extract_strided_slice %22 {offsets = [0, 0, 16], sizes = [2, 24, 8], strides = [1, 1, 1]} : vector<2x24x32xbf16> to vector<2x24x8xbf16>
    %69 = vector.extract_strided_slice %24 {offsets = [0, 0, 16], sizes = [2, 24, 8], strides = [1, 1, 1]} : vector<2x24x32xbf16> to vector<2x24x8xbf16>
    "tpu.trace_start"() <{level = 10 : i32, message = "bqd,bkd->bqk"}> : () -> ()
    %cst_21 = arith.constant dense<0.000000e+00> : vector<2x24x24xf32>
    %70 = tpu.matmul %67, %68, %cst_21 {dimension_numbers = #tpu.dot_dimension_numbers<[2], [2], [1], [1], [0, 0, 0, 1, 1, 1], [0], [0]>} : vector<2x24x8xbf16>, vector<2x24x8xbf16>, vector<2x24x24xf32> -> vector<2x24x24xf32>
    "tpu.trace_stop"() : () -> ()
    %cst_22 = arith.constant 0.353553385 : f32
    %71 = vector.broadcast %cst_22 : f32 to vector<2x24x24xf32>
    %72 = arith.mulf %70, %71 : vector<2x24x24xf32>
    %73 = vector.broadcast %10 : vector<1x1x24xf32> to vector<2x24x24xf32>
    %74 = arith.addf %72, %73 : vector<2x24x24xf32>
    %cst_23 = arith.constant dense<0xFF800000> : vector<2x24xf32>
    %75 = vector.multi_reduction <maximumf>, %74, %cst_23 [2] : vector<2x24x24xf32> to vector<2x24xf32>
    %76 = vector.shape_cast %75 : vector<2x24xf32> to vector<2x24x1xf32>
    %77 = vector.broadcast %76 : vector<2x24x1xf32> to vector<2x24x24xf32>
    %78 = arith.subf %74, %77 : vector<2x24x24xf32>
    %79 = math.exp %78 : vector<2x24x24xf32>
    %cst_24 = arith.constant dense<0.000000e+00> : vector<2x24xf32>
    %80 = vector.multi_reduction <add>, %79, %cst_24 [2] : vector<2x24x24xf32> to vector<2x24xf32>
    %81 = vector.shape_cast %80 : vector<2x24xf32> to vector<2x24x1xf32>
    %82 = tpu.reciprocal %81 {approx = true} : vector<2x24x1xf32> -> vector<2x24x1xf32>
    %83 = vector.broadcast %82 : vector<2x24x1xf32> to vector<2x24x24xf32>
    %84 = arith.mulf %79, %83 : vector<2x24x24xf32>
    %85 = arith.truncf %84 : vector<2x24x24xf32> to vector<2x24x24xbf16>
    "tpu.trace_start"() <{level = 10 : i32, message = "bqk,bkd->bqd"}> : () -> ()
    %cst_25 = arith.constant dense<0.000000e+00> : vector<2x24x8xf32>
    %86 = tpu.matmul %85, %69, %cst_25 {dimension_numbers = #tpu.dot_dimension_numbers<[2], [1], [1], [2], [0, 0, 0, 1, 1, 2], [0], [0]>} : vector<2x24x24xbf16>, vector<2x24x8xbf16>, vector<2x24x8xf32> -> vector<2x24x8xf32>
    "tpu.trace_stop"() : () -> ()
    %87 = arith.truncf %86 : vector<2x24x8xf32> to vector<2x24x8xbf16>
    %88 = vector.extract_strided_slice %20 {offsets = [0, 0, 24], sizes = [2, 24, 8], strides = [1, 1, 1]} : vector<2x24x32xbf16> to vector<2x24x8xbf16>
    %89 = vector.extract_strided_slice %22 {offsets = [0, 0, 24], sizes = [2, 24, 8], strides = [1, 1, 1]} : vector<2x24x32xbf16> to vector<2x24x8xbf16>
    %90 = vector.extract_strided_slice %24 {offsets = [0, 0, 24], sizes = [2, 24, 8], strides = [1, 1, 1]} : vector<2x24x32xbf16> to vector<2x24x8xbf16>
    "tpu.trace_start"() <{level = 10 : i32, message = "bqd,bkd->bqk"}> : () -> ()
    %cst_26 = arith.constant dense<0.000000e+00> : vector<2x24x24xf32>
    %91 = tpu.matmul %88, %89, %cst_26 {dimension_numbers = #tpu.dot_dimension_numbers<[2], [2], [1], [1], [0, 0, 0, 1, 1, 1], [0], [0]>} : vector<2x24x8xbf16>, vector<2x24x8xbf16>, vector<2x24x24xf32> -> vector<2x24x24xf32>
    "tpu.trace_stop"() : () -> ()
    %cst_27 = arith.constant 0.353553385 : f32
    %92 = vector.broadcast %cst_27 : f32 to vector<2x24x24xf32>
    %93 = arith.mulf %91, %92 : vector<2x24x24xf32>
    %94 = vector.broadcast %10 : vector<1x1x24xf32> to vector<2x24x24xf32>
    %95 = arith.addf %93, %94 : vector<2x24x24xf32>
    %cst_28 = arith.constant dense<0xFF800000> : vector<2x24xf32>
    %96 = vector.multi_reduction <maximumf>, %95, %cst_28 [2] : vector<2x24x24xf32> to vector<2x24xf32>
    %97 = vector.shape_cast %96 : vector<2x24xf32> to vector<2x24x1xf32>
    %98 = vector.broadcast %97 : vector<2x24x1xf32> to vector<2x24x24xf32>
    %99 = arith.subf %95, %98 : vector<2x24x24xf32>
    %100 = math.exp %99 : vector<2x24x24xf32>
    %cst_29 = arith.constant dense<0.000000e+00> : vector<2x24xf32>
    %101 = vector.multi_reduction <add>, %100, %cst_29 [2] : vector<2x24x24xf32> to vector<2x24xf32>
    %102 = vector.shape_cast %101 : vector<2x24xf32> to vector<2x24x1xf32>
    %103 = tpu.reciprocal %102 {approx = true} : vector<2x24x1xf32> -> vector<2x24x1xf32>
    %104 = vector.broadcast %103 : vector<2x24x1xf32> to vector<2x24x24xf32>
    %105 = arith.mulf %100, %104 : vector<2x24x24xf32>
    %106 = arith.truncf %105 : vector<2x24x24xf32> to vector<2x24x24xbf16>
    "tpu.trace_start"() <{level = 10 : i32, message = "bqk,bkd->bqd"}> : () -> ()
    %cst_30 = arith.constant dense<0.000000e+00> : vector<2x24x8xf32>
    %107 = tpu.matmul %106, %90, %cst_30 {dimension_numbers = #tpu.dot_dimension_numbers<[2], [1], [1], [2], [0, 0, 0, 1, 1, 2], [0], [0]>} : vector<2x24x24xbf16>, vector<2x24x8xbf16>, vector<2x24x8xf32> -> vector<2x24x8xf32>
    "tpu.trace_stop"() : () -> ()
    %108 = arith.truncf %107 : vector<2x24x8xf32> to vector<2x24x8xbf16>
    %109 = tpu.concatenate %45, %66, %87, %108 in 2 : vector<2x24x8xbf16>, vector<2x24x8xbf16>, vector<2x24x8xbf16>, vector<2x24x8xbf16> -> vector<2x24x32xbf16>
    %110 = vector.shape_cast %109 : vector<2x24x32xbf16> to vector<48x32xbf16>
    %c0_31 = arith.constant 0 : index
    %c0_32 = arith.constant 0 : index
    %c0_33 = arith.constant 0 : index
    %111 = vector.load %arg8[%c0_31, %c0_32, %c0_33] : memref<1x32x32xbf16, #tpu.memory_space<vmem>>, vector<1x32x32xbf16>
    %112 = vector.shape_cast %111 : vector<1x32x32xbf16> to vector<32x32xbf16>
    %cst_34 = arith.constant dense<0.000000e+00> : vector<48x32xf32>
    %113 = tpu.matmul %110, %112, %cst_34 {dimension_numbers = #tpu.dot_dimension_numbers<[1], [0], [0], [1], [0, 0, 1, 1], [], []>} : vector<48x32xbf16>, vector<32x32xbf16>, vector<48x32xf32> -> vector<48x32xf32>
    %c0_35 = arith.constant 0 : index
    %c0_36 = arith.constant 0 : index
    %c0_37 = arith.constant 0 : index
    %114 = vector.load %arg9[%c0_35, %c0_36, %c0_37] : memref<1x1x32xf32, #tpu.memory_space<vmem>>, vector<1x1x32xf32>
    %115 = vector.shape_cast %114 : vector<1x1x32xf32> to vector<1x32xf32>
    %116 = vector.broadcast %115 : vector<1x32xf32> to vector<48x32xf32>
    %117 = arith.addf %113, %116 : vector<48x32xf32>
    %118 = arith.extf %4 : vector<48x32xbf16> to vector<48x32xf32>
    %119 = arith.addf %118, %117 : vector<48x32xf32>
    %c0_38 = arith.constant 0 : index
    %c0_39 = arith.constant 0 : index
    %c0_40 = arith.constant 0 : index
    %120 = vector.load %arg10[%c0_38, %c0_39, %c0_40] : memref<1x1x32xf32, #tpu.memory_space<vmem>>, vector<1x1x32xf32>
    %121 = vector.shape_cast %120 : vector<1x1x32xf32> to vector<1x32xf32>
    %c0_41 = arith.constant 0 : index
    %c0_42 = arith.constant 0 : index
    %c0_43 = arith.constant 0 : index
    %122 = vector.load %arg11[%c0_41, %c0_42, %c0_43] : memref<1x1x32xf32, #tpu.memory_space<vmem>>, vector<1x1x32xf32>
    %123 = vector.shape_cast %122 : vector<1x1x32xf32> to vector<1x32xf32>
    %cst_44 = arith.constant dense<0.000000e+00> : vector<48xf32>
    %124 = vector.multi_reduction <add>, %119, %cst_44 [1] : vector<48x32xf32> to vector<48xf32>
    %125 = vector.shape_cast %124 : vector<48xf32> to vector<48x1xf32>
    %cst_45 = arith.constant 3.200000e+01 : f32
    %126 = vector.broadcast %cst_45 : f32 to vector<48x1xf32>
    %127 = arith.divf %125, %126 : vector<48x1xf32>
    %128 = vector.broadcast %127 : vector<48x1xf32> to vector<48x32xf32>
    %129 = arith.subf %119, %128 : vector<48x32xf32>
    %130 = arith.mulf %129, %129 : vector<48x32xf32>
    %cst_46 = arith.constant dense<0.000000e+00> : vector<48xf32>
    %131 = vector.multi_reduction <add>, %130, %cst_46 [1] : vector<48x32xf32> to vector<48xf32>
    %132 = vector.shape_cast %131 : vector<48xf32> to vector<48x1xf32>
    %cst_47 = arith.constant 3.200000e+01 : f32
    %133 = vector.broadcast %cst_47 : f32 to vector<48x1xf32>
    %134 = arith.divf %132, %133 : vector<48x1xf32>
    %135 = vector.broadcast %127 : vector<48x1xf32> to vector<48x32xf32>
    %136 = arith.subf %119, %135 : vector<48x32xf32>
    %cst_48 = arith.constant 9.99999974E-6 : f32
    %137 = vector.broadcast %cst_48 : f32 to vector<48x1xf32>
    %138 = arith.addf %134, %137 : vector<48x1xf32>
    %139 = math.rsqrt %138 : vector<48x1xf32>
    %140 = vector.broadcast %139 : vector<48x1xf32> to vector<48x32xf32>
    %141 = arith.mulf %136, %140 : vector<48x32xf32>
    %142 = vector.broadcast %121 : vector<1x32xf32> to vector<48x32xf32>
    %143 = arith.mulf %141, %142 : vector<48x32xf32>
    %144 = vector.broadcast %123 : vector<1x32xf32> to vector<48x32xf32>
    %145 = arith.addf %143, %144 : vector<48x32xf32>
    %146 = arith.truncf %145 : vector<48x32xf32> to vector<48x32xbf16>
    %c0_49 = arith.constant 0 : index
    %c0_50 = arith.constant 0 : index
    %c0_51 = arith.constant 0 : index
    %147 = vector.load %arg12[%c0_49, %c0_50, %c0_51] : memref<1x32x128xbf16, #tpu.memory_space<vmem>>, vector<1x32x128xbf16>
    %148 = vector.shape_cast %147 : vector<1x32x128xbf16> to vector<32x128xbf16>
    %cst_52 = arith.constant dense<0.000000e+00> : vector<48x128xf32>
    %149 = tpu.matmul %146, %148, %cst_52 {dimension_numbers = #tpu.dot_dimension_numbers<[1], [0], [0], [1], [0, 0, 1, 1], [], []>} : vector<48x32xbf16>, vector<32x128xbf16>, vector<48x128xf32> -> vector<48x128xf32>
    %c0_53 = arith.constant 0 : index
    %c0_54 = arith.constant 0 : index
    %c0_55 = arith.constant 0 : index
    %150 = vector.load %arg13[%c0_53, %c0_54, %c0_55] : memref<1x1x128xf32, #tpu.memory_space<vmem>>, vector<1x1x128xf32>
    %151 = vector.shape_cast %150 : vector<1x1x128xf32> to vector<1x128xf32>
    %152 = vector.broadcast %151 : vector<1x128xf32> to vector<48x128xf32>
    %153 = arith.addf %149, %152 : vector<48x128xf32>
    %cst_56 = arith.constant 0.000000e+00 : f32
    %154 = vector.broadcast %cst_56 : f32 to vector<48x128xf32>
    %155 = arith.maximumf %153, %154 : vector<48x128xf32>
    %156 = arith.truncf %155 : vector<48x128xf32> to vector<48x128xbf16>
    %c0_57 = arith.constant 0 : index
    %c0_58 = arith.constant 0 : index
    %c0_59 = arith.constant 0 : index
    %157 = vector.load %arg14[%c0_57, %c0_58, %c0_59] : memref<1x128x32xbf16, #tpu.memory_space<vmem>>, vector<1x128x32xbf16>
    %158 = vector.shape_cast %157 : vector<1x128x32xbf16> to vector<128x32xbf16>
    %cst_60 = arith.constant dense<0.000000e+00> : vector<48x32xf32>
    %159 = tpu.matmul %156, %158, %cst_60 {dimension_numbers = #tpu.dot_dimension_numbers<[1], [0], [0], [1], [0, 0, 1, 1], [], []>} : vector<48x128xbf16>, vector<128x32xbf16>, vector<48x32xf32> -> vector<48x32xf32>
    %c0_61 = arith.constant 0 : index
    %c0_62 = arith.constant 0 : index
    %c0_63 = arith.constant 0 : index
    %160 = vector.load %arg15[%c0_61, %c0_62, %c0_63] : memref<1x1x32xf32, #tpu.memory_space<vmem>>, vector<1x1x32xf32>
    %161 = vector.shape_cast %160 : vector<1x1x32xf32> to vector<1x32xf32>
    %162 = vector.broadcast %161 : vector<1x32xf32> to vector<48x32xf32>
    %163 = arith.addf %159, %162 : vector<48x32xf32>
    %164 = arith.addf %145, %163 : vector<48x32xf32>
    %c0_64 = arith.constant 0 : index
    %c0_65 = arith.constant 0 : index
    %c0_66 = arith.constant 0 : index
    %165 = vector.load %arg16[%c0_64, %c0_65, %c0_66] : memref<1x1x32xf32, #tpu.memory_space<vmem>>, vector<1x1x32xf32>
    %166 = vector.shape_cast %165 : vector<1x1x32xf32> to vector<1x32xf32>
    %c0_67 = arith.constant 0 : index
    %c0_68 = arith.constant 0 : index
    %c0_69 = arith.constant 0 : index
    %167 = vector.load %arg17[%c0_67, %c0_68, %c0_69] : memref<1x1x32xf32, #tpu.memory_space<vmem>>, vector<1x1x32xf32>
    %168 = vector.shape_cast %167 : vector<1x1x32xf32> to vector<1x32xf32>
    %cst_70 = arith.constant dense<0.000000e+00> : vector<48xf32>
    %169 = vector.multi_reduction <add>, %164, %cst_70 [1] : vector<48x32xf32> to vector<48xf32>
    %170 = vector.shape_cast %169 : vector<48xf32> to vector<48x1xf32>
    %cst_71 = arith.constant 3.200000e+01 : f32
    %171 = vector.broadcast %cst_71 : f32 to vector<48x1xf32>
    %172 = arith.divf %170, %171 : vector<48x1xf32>
    %173 = vector.broadcast %172 : vector<48x1xf32> to vector<48x32xf32>
    %174 = arith.subf %164, %173 : vector<48x32xf32>
    %175 = arith.mulf %174, %174 : vector<48x32xf32>
    %cst_72 = arith.constant dense<0.000000e+00> : vector<48xf32>
    %176 = vector.multi_reduction <add>, %175, %cst_72 [1] : vector<48x32xf32> to vector<48xf32>
    %177 = vector.shape_cast %176 : vector<48xf32> to vector<48x1xf32>
    %cst_73 = arith.constant 3.200000e+01 : f32
    %178 = vector.broadcast %cst_73 : f32 to vector<48x1xf32>
    %179 = arith.divf %177, %178 : vector<48x1xf32>
    %180 = vector.broadcast %172 : vector<48x1xf32> to vector<48x32xf32>
    %181 = arith.subf %164, %180 : vector<48x32xf32>
    %cst_74 = arith.constant 9.99999974E-6 : f32
    %182 = vector.broadcast %cst_74 : f32 to vector<48x1xf32>
    %183 = arith.addf %179, %182 : vector<48x1xf32>
    %184 = math.rsqrt %183 : vector<48x1xf32>
    %185 = vector.broadcast %184 : vector<48x1xf32> to vector<48x32xf32>
    %186 = arith.mulf %181, %185 : vector<48x32xf32>
    %187 = vector.broadcast %166 : vector<1x32xf32> to vector<48x32xf32>
    %188 = arith.mulf %186, %187 : vector<48x32xf32>
    %189 = vector.broadcast %168 : vector<1x32xf32> to vector<48x32xf32>
    %190 = arith.addf %188, %189 : vector<48x32xf32>
    %191 = vector.shape_cast %190 : vector<48x32xf32> to vector<2x24x32xf32>
    %192 = arith.truncf %191 : vector<2x24x32xf32> to vector<2x24x32xbf16>
    %c0_75 = arith.constant 0 : index
    %c0_76 = arith.constant 0 : index
    %c0_77 = arith.constant 0 : index
    %193 = vector.load %arg19[%c0_75, %c0_76, %c0_77] : memref<2x24x32xbf16, #tpu.memory_space<vmem>>, vector<2x24x32xbf16>
    tpu.vector_store %arg19[%c0_75, %c0_76, %c0_77], %192 {strides = array<i32>} : memref<2x24x32xbf16, #tpu.memory_space<vmem>>, vector<2x24x32xbf16>,
    %c1_i32 = arith.constant 1 : i32
    %194 = arith.cmpi eq, %arg1, %c1_i32 : i32
    %195 = arith.extui %194 : i1 to i32
    %c0_i32_78 = arith.constant 0 : i32
    %196 = arith.cmpi ne, %195, %c0_i32_78 : i32
    scf.if %196 {
      %197 = vector.shape_cast %190 : vector<48x32xf32> to vector<2x24x32xf32>
      %c0_79 = arith.constant 0 : index
      %c0_80 = arith.constant 0 : index
      %c0_81 = arith.constant 0 : index
      %198 = vector.load %arg18[%c0_79, %c0_80, %c0_81] : memref<2x24x32xf32, #tpu.memory_space<vmem>>, vector<2x24x32xf32>
      tpu.vector_store %arg18[%c0_79, %c0_80, %c0_81], %197 {strides = array<i32>} : memref<2x24x32xf32, #tpu.memory_space<vmem>>, vector<2x24x32xf32>,
    } else {
    }
    return
  }
  func.func @transform_0(%arg0: i32, %arg1: i32) -> (i32, i32, i32) {
    %c0_i32 = arith.constant 0 : i32
    %c0_i32_0 = arith.constant 0 : i32
    %c0_i32_1 = arith.constant 0 : i32
    return %arg0, %c0_i32, %c0_i32_0 : i32, i32, i32
  }
  func.func @transform_1(%arg0: i32, %arg1: i32) -> (i32, i32) {
    %c0_i32 = arith.constant 0 : i32
    %c0_i32_0 = arith.constant 0 : i32
    %c0_i32_1 = arith.constant 0 : i32
    return %c0_i32, %c0_i32_0 : i32, i32
  }
  func.func @transform_2(%arg0: i32, %arg1: i32) -> (i32, i32) {
    %c0_i32 = arith.constant 0 : i32
    %c0_i32_0 = arith.constant 0 : i32
    %c0_i32_1 = arith.constant 0 : i32
    return %c0_i32, %c0_i32_0 : i32, i32
  }
  func.func @transform_3(%arg0: i32, %arg1: i32) -> (i32, i32) {
    %c0_i32 = arith.constant 0 : i32
    %c0_i32_0 = arith.constant 0 : i32
    %c0_i32_1 = arith.constant 0 : i32
    return %c0_i32, %c0_i32_0 : i32, i32
  }
  func.func @transform_4(%arg0: i32, %arg1: i32) -> (i32, i32, i32) {
    %c0_i32 = arith.constant 0 : i32
    %c0_i32_0 = arith.constant 0 : i32
    %c0_i32_1 = arith.constant 0 : i32
    return %arg1, %c0_i32, %c0_i32_0 : i32, i32, i32
  }
  func.func @transform_5(%arg0: i32, %arg1: i32) -> (i32, i32, i32) {
    %c0_i32 = arith.constant 0 : i32
    %c0_i32_0 = arith.constant 0 : i32
    %c0_i32_1 = arith.constant 0 : i32
    return %arg1, %c0_i32, %c0_i32_0 : i32, i32, i32
  }
  func.func @transform_6(%arg0: i32, %arg1: i32) -> (i32, i32, i32) {
    %c0_i32 = arith.constant 0 : i32
    %c0_i32_0 = arith.constant 0 : i32
    %c0_i32_1 = arith.constant 0 : i32
    return %arg1, %c0_i32, %c0_i32_0 : i32, i32, i32
  }
  func.func @transform_7(%arg0: i32, %arg1: i32) -> (i32, i32, i32) {
    %c0_i32 = arith.constant 0 : i32
    %c0_i32_0 = arith.constant 0 : i32
    %c0_i32_1 = arith.constant 0 : i32
    return %arg1, %c0_i32, %c0_i32_0 : i32, i32, i32
  }
  func.func @transform_8(%arg0: i32, %arg1: i32) -> (i32, i32, i32) {
    %c0_i32 = arith.constant 0 : i32
    %c0_i32_0 = arith.constant 0 : i32
    %c0_i32_1 = arith.constant 0 : i32
    return %arg1, %c0_i32, %c0_i32_0 : i32, i32, i32
  }
  func.func @transform_9(%arg0: i32, %arg1: i32) -> (i32, i32, i32) {
    %c0_i32 = arith.constant 0 : i32
    %c0_i32_0 = arith.constant 0 : i32
    %c0_i32_1 = arith.constant 0 : i32
    return %arg1, %c0_i32, %c0_i32_0 : i32, i32, i32
  }
  func.func @transform_10(%arg0: i32, %arg1: i32) -> (i32, i32, i32) {
    %c0_i32 = arith.constant 0 : i32
    %c0_i32_0 = arith.constant 0 : i32
    %c0_i32_1 = arith.constant 0 : i32
    return %arg1, %c0_i32, %c0_i32_0 : i32, i32, i32
  }
  func.func @transform_11(%arg0: i32, %arg1: i32) -> (i32, i32, i32) {
    %c0_i32 = arith.constant 0 : i32
    %c0_i32_0 = arith.constant 0 : i32
    %c0_i32_1 = arith.constant 0 : i32
    return %arg1, %c0_i32, %c0_i32_0 : i32, i32, i32
  }
  func.func @transform_12(%arg0: i32, %arg1: i32) -> (i32, i32, i32) {
    %c0_i32 = arith.constant 0 : i32
    %c0_i32_0 = arith.constant 0 : i32
    %c0_i32_1 = arith.constant 0 : i32
    return %arg1, %c0_i32, %c0_i32_0 : i32, i32, i32
  }
  func.func @transform_13(%arg0: i32, %arg1: i32) -> (i32, i32, i32) {
    %c0_i32 = arith.constant 0 : i32
    %c0_i32_0 = arith.constant 0 : i32
    %c0_i32_1 = arith.constant 0 : i32
    return %arg1, %c0_i32, %c0_i32_0 : i32, i32, i32
  }
  func.func @transform_14(%arg0: i32, %arg1: i32) -> (i32, i32, i32) {
    %c0_i32 = arith.constant 0 : i32
    %c0_i32_0 = arith.constant 0 : i32
    %c0_i32_1 = arith.constant 0 : i32
    return %arg1, %c0_i32, %c0_i32_0 : i32, i32, i32
  }
  func.func @transform_15(%arg0: i32, %arg1: i32) -> (i32, i32, i32) {
    %c0_i32 = arith.constant 0 : i32
    %c0_i32_0 = arith.constant 0 : i32
    %c0_i32_1 = arith.constant 0 : i32
    return %arg1, %c0_i32, %c0_i32_0 : i32, i32, i32
  }
  func.func @transform_16(%arg0: i32, %arg1: i32) -> (i32, i32, i32) {
    %c0_i32 = arith.constant 0 : i32
    %c0_i32_0 = arith.constant 0 : i32
    %c0_i32_1 = arith.constant 0 : i32
    return %arg0, %c0_i32, %c0_i32_0 : i32, i32, i32
  }
}

</mosaic_0001>

<bundles_post_ra>
// kernel: tpu_custom_call.1
= control target key start
LH: loop header
LB: loop body
LE: loop exit
PB: predicated region body
PF: predicated region fallthrough
CT: control target
= control target key end

     0   :  { %s4744_s0 = inlined_call_operand.vmem [shape: f32[2,24,16], index: 0, kind: input, shape index: {}]   ;;  %s4745_s1 = inlined_call_operand.vmem [shape: bf16[16,32], index: 1, kind: input, shape index: {}]   ;;  %s4746_s2 = inlined_call_operand.vmem [shape: f32[1,32], index: 2, kind: input, shape index: {}]   ;;  %s4747_s3 = inlined_call_operand.vmem [shape: f32[24,32], index: 3, kind: input, shape index: {}]   ;;  %s4748_s4 = inlined_call_operand.vmem [shape: bf16[2,32,96], index: 4, kind: input, shape index: {}]   ;;  %s4749_s5 = inlined_call_operand.vmem [shape: f32[2,1,96], index: 5, kind: input, shape index: {}]   ;;  %s4750_s6 = inlined_call_operand.vmem [shape: bf16[2,32,32], index: 6, kind: input, shape index: {}]   ;;  %s4751_s7 = inlined_call_operand.vmem [shape: f32[2,1,32], index: 7, kind: input, shape index: {}]   ;;  %s4752_s8 = inlined_call_operand.vmem [shape: f32[2,1,32], index: 8, kind: input, shape index: {}]   ;;  %s4753_s9 = inlined_call_operand.vmem [shape: f32[2,1,32], index: 9, kind: input, shape index: {}]   ;;  %s4754_s10 = inlined_call_operand.vmem [shape: bf16[2,32,128], index: 10, kind: input, shape index: {}]   ;;  %s4755_s11 = inlined_call_operand.vmem [shape: f32[2,1,128], index: 11, kind: input, shape index: {}]   ;;  %s4756_s12 = inlined_call_operand.vmem [shape: bf16[2,128,32], index: 12, kind: input, shape index: {}]   ;;  %s4757_s13 = inlined_call_operand.vmem [shape: f32[2,1,32], index: 13, kind: input, shape index: {}]   ;;  %s4758_s14 = inlined_call_operand.vmem [shape: f32[2,1,32], index: 14, kind: input, shape index: {}]   ;;  %s4759_s15 = inlined_call_operand.vmem [shape: f32[2,1,32], index: 15, kind: input, shape index: {}]   ;;  %s4760_s16 = inlined_call_operand.hbm [shape: f32[2,24,32], index: 16, kind: output, shape index: {}]  }
   0x1   :  { %4767 = sst [smem:[#allocation10_spill]] %s4744_s0 }
   0x2   :  { %4768 = sst [smem:[#allocation11_spill]] %s4746_s2 }
   0x3   :  { %4769 = sst [smem:[#allocation12_spill]] %s4747_s3 }
   0x4   :  { %4770 = sst [smem:[#allocation13_spill]] %s4748_s4 }
   0x5   :  { %4771 = sst [smem:[#allocation14_spill]] %s4750_s6 }
   0x6   :  { %4772 = sst [smem:[#allocation15_spill]] %s4760_s16 }
   0x7   :  { %21 = vsyncpa [#allocation4], 0  ;;  %s4027_s21 = smov 0   ;;  %s4029_s22 = smov 0  }
   0x8   :  { %s4031_s23 = smov 0  }
   0x9 LB: > { %4773 = sst [smem:[#allocation6_spill]] %s3915_s22  ;;  %s36_s25 = sadd.s32 1, %s3915_s22  ;;  %s3919_s23 = sphi %s4031_s23, %s27_s23   ;;  %s3915_s22 = sphi %s4029_s22, %s4793_s22   ;;  %s3911_s21 = sphi %s4027_s21, %s4792_s21  }
   0xa   : > { %4774 = sst [smem:[#allocation7_spill]] %s3919_s23  ;;  %p37_p0 = scmp.ge.s32.totalorder %s36_s25, 2 }
   0xb   : > { %p3219_p1 = scmp.ge.s32.totalorder %s3919_s23, 1  ;;  %p581_p2 = scmp.lt.s32.totalorder %s3919_s23, 3 }
   0xc   : > { %s4795_s25 = smov (%p37_p0, %s36_s25), 0 }
   0xd   : > { %4775 = sst [smem:[#allocation8_spill]] %s4795_s25  ;;  %p582_p3 = pnand %p3219_p1, %p581_p2 }
   0xf   : > { %585 = sbr.rel (%p582_p3) target bundleno = 4663 (0x1237), region = 84 }
  0x16   : > { %p678_p4 = scmp.lt.s32.totalorder %s3911_s21, 1  ;;  %s4776_s4 = sld [smem:[#allocation13_spill]] }
  0x17   : > { %s4777_s6 = sld [smem:[#allocation14_spill]]  ;;  %p3228_p5 = scmp.ne.s32.totalorder %s3911_s21, 0 }
  0x18   : > { %s4050_s26 = scalar_select %p678_p4, %s3911_s21, 1 }
  0x19   : > { %727 = sbr.rel (%p3228_p5) target bundleno = 263 (0x107), region = 88  ;;  %v3723_v0 = vld [vmem:[%s4745_s1] sm:$0xff] (!%p3228_p5)   ;;  %v3921_v1 = vmov (!%p3228_p5), 0.0   ;;  %s4779_s25 = sld [smem:[#allocation10_spill]] (!%p3228_p5)  ;;  %vm3922_vm0 = vmmov (!%p3228_p5), 0   ;;  %vm752_vm1 = vcmask (!%p3228_p5), 130048  }
  0x1a   : > { %s3318_s27 = sshll.u32 %s4050_s26, 4  ;;  %s715_s28 = scalar_lea.vmem %s4757_s13, %s4050_s26  ;;  %3646 = vmatprep.subr.bf16.mxu1 (!%p3228_p5), %v3921_v1  ;;  %3428 = vmatprep.subr.bf16.mxu0 (!%p3228_p5), %v3921_v1  ;;  %vm854_vm2 = vcmask (!%p3228_p5), 257024  }
  0x1b   : > { %s718_s0 = scalar_lea.vmem %s4758_s14, %s4050_s26  ;;  %s721_s2 = scalar_lea.vmem %s4759_s15, %s4050_s26  ;;  %3647 = vmatpush3.bf16.msra.mxu1 (!%p3228_p5), %v3723_v0  ;;  %3434 = vmatprep.mubr.msk.bf16.mxu1 (!%p3228_p5), %vm3922_vm0, %v3921_v1 }
  0x1c   : > { %s4060_s18 = scalar_lea.vmem %s4776_s4, %s3318_s27  ;;  %s4082_s4 = scalar_lea.vmem %s4754_s10, %s3318_s27  ;;  %3429 = vmatpush3.bf16.msra.mxu0 (!%p3228_p5), %v3723_v0  ;;  %3430 = vmatprep.mubr.msk.bf16.mxu0 (!%p3228_p5), %vm3922_vm0, %v3921_v1 }
  0x1d   : > { %s4065_s24 = scalar_lea.vmem %s4777_s6, %s3318_s27  ;;  %s707_s6 = scalar_lea.vmem %s4755_s11, %s4050_s26 }
  0x1e   : > { %4778 = sst [smem:[#allocation9_spill]] %s4065_s24  ;;  %s3321_s24 = sshll.u32 %s4050_s26, 6 }
  0x1f   : > { %s4092_s16 = scalar_lea.vmem %s4756_s12, %s3321_s24  ;;  %v730_v2 = vld [vmem:[%s4779_s25 + $0x10] sm:$0xff] (!%p3228_p5)  ;;  %v731_v3 = vld [vmem:[%s4779_s25 + $0x18] sm:$0xff] (!%p3228_p5)  ;;  %v728_v4 = vld [vmem:[%s4779_s25] sm:$0xff] (!%p3228_p5)  ;;  %s4780_s23 = sld [smem:[#allocation11_spill]] (!%p3228_p5) }
  0x20   : > { %v735_v5 = vpack.c.bf16 %v731_v3, %v730_v2  ;;  %v729_v6 = vld [vmem:[%s4779_s25 + $0x8] sm:$0xff]  ;;  %v732_v8 = vld [vmem:[%s4779_s25 + $0x20] sm:$0xff]  ;;  %s4781_s17 = sld [smem:[#allocation12_spill]] }
  0x21   : > { %v734_v7 = vpack.c.bf16 %v729_v6, %v728_v4  ;;  %v733_v9 = vld [vmem:[%s4779_s25 + $0x28] sm:$0xff] }
  0x22   : > { %3435 = vmatmul.mubr.msk.bf16.vlgmr.msra.gmra.mrb[0].mxu1 %vm752_vm1, %v735_v5  ;;  %v736_v10 = vpack.c.bf16 %v733_v9, %v732_v8 }
  0x23   : > { %3431 = vmatmul.mubr.msk.bf16.vlgmr.msra.gmra.mrb[0].mxu0 %vm752_vm1, %v734_v7  ;;  %3438 = vmatprep.mubr.msk.bf16.mxu1 %vm3922_vm0, %v3921_v1 }
  0x25   : > { %v3229_v11 = vld [vmem:[%s4780_s23] ss:$0 sm:$0xff] }
  0x26   : > { %v821_v13 = vld [vmem:[%s4781_s17 + $0x10] sm:$0xff]  ;;  %v819_v18 = vld [vmem:[%s4781_s17] sm:$0xff]  ;;  %v820_v25 = vld [vmem:[%s4781_s17 + $0x8] sm:$0xff] }
  0x2a   : > { %3439 = vmatmul.mubr.msk.bf16.gmra.mrb[4].mxu1 %vm752_vm1, %v736_v10 }
  0xf5   : > { %v804_v12 = vpop.f32.mrb[0].mxu1 }
  0xf6   : > { %v805_v14 = vadd.f32 %v3229_v11, %v804_v12  ;;  %v3436_v15 = vpop.f32.mrb[1].mxu1  ;;  %v796_v16 = vpop.f32.mrb[0].mxu0 }
  0xf7   : > { %v807_v17 = vpop.f32.mrb[2].mxu1  ;;  %v797_v19 = vadd.f32 %v3229_v11, %v796_v16  ;;  %v3432_v20 = vpop.f32.mrb[1].mxu0 }
  0xf8   : > { %v824_v21 = vadd.f32 %v821_v13, %v805_v14  ;;  %v808_v22 = vadd.f32 %v3229_v11, %v807_v17  ;;  %v3437_v23 = vpop.f32.mrb[3].mxu1  ;;  %v799_v24 = vpop.f32.mrb[2].mxu0 }
  0xf9   : > { %v822_v26 = vadd.f32 %v819_v18, %v797_v19  ;;  %v800_v27 = vadd.f32 %v3229_v11, %v799_v24  ;;  %v3433_v28 = vpop.f32.mrb[3].mxu0 }
  0xfa   : > { %v3324_v29 = vpack.c.bf16 %v824_v21, %v824_v21  ;;  %v825_v30 = vadd.f32 %v819_v18, %v808_v22 }
  0xfb   : > { %v3322_v31 = vpack.c.bf16 %v822_v26, %v822_v26  ;;  %v823_v32 = vadd.f32 %v820_v25, %v800_v27 }
  0xfc   : > { %857 = vst.msk [vmem:[#allocation2 + $0x8] sm:$0xf] %vm854_vm2, %v3324_v29  ;;  %v3325_v33 = vpack.c.bf16 %v825_v30, %v825_v30 }
  0xfd   : > { %855 = vst.msk [vmem:[#allocation2] sm:$0xf] %vm854_vm2, %v3322_v31  ;;  %v3323_v34 = vpack.c.bf16 %v823_v32, %v823_v32  ;;  %v812_v35 = vpop.f32.mrb[4].mxu1 }
  0xfe   : > { %858 = vst.msk [vmem:[#allocation2 + $0xc] sm:$0xf] %vm854_vm2, %v3325_v33  ;;  %v813_v36 = vadd.f32 %v3229_v11, %v812_v35  ;;  %v3440_v37 = vpop.f32.mrb[5].mxu1 }
  0xff   : > { %856 = vst.msk [vmem:[#allocation2 + $0x4] sm:$0xf] %vm854_vm2, %v3323_v34  ;;  %v815_v38 = vpop.f32.mrb[6].mxu1 }
 0x100   : > { %v826_v39 = vadd.f32 %v820_v25, %v813_v36  ;;  %v816_v40 = vadd.f32 %v3229_v11, %v815_v38  ;;  %v3441_v41 = vpop.f32.mrb[7].mxu1 }
 0x102   : > { %v3326_v42 = vpack.c.bf16 %v826_v39, %v826_v39  ;;  %v827_v43 = vadd.f32 %v821_v13, %v816_v40 }
 0x104   : > { %859 = vst.msk [vmem:[#allocation2 + $0x10] sm:$0xf] %vm854_vm2, %v3326_v42  ;;  %v3327_v44 = vpack.c.bf16 %v827_v43, %v827_v43 }
 0x106   : > { %860 = vst.msk [vmem:[#allocation2 + $0x14] sm:$0xf] %vm854_vm2, %v3327_v44 }
 0x107 PF: > { %v3724_v45 = vld [vmem:[%s4060_s18] sm:$0xff]   ;;  %v3923_v46 = vmov 0.0   ;;  %v3725_v47 = vld [vmem:[%s4060_s18 + $0x8] sm:$0xff]   ;;  %vm3924_vm3 = vmmov 0   ;;  %v861_v48 = vld [vmem:[#allocation2] sm:$0xff]   ;;  %vm909_vm4 = vcmask 261120   ;;  %s4782_s30 = scalar_lea.vmem %s4749_s5, %s4050_s26  ;;  %v867_v19 = vlaneseq }
 0x108   : > { %3442 = vmatprep.subr.bf16.mxu1 %v3923_v46  ;;  %3446 = vmatprep.mubr.msk.bf16.mxu1 %vm3924_vm3, %v3923_v46  ;;  %v863_v49 = vld [vmem:[#allocation2 + $0x8] sm:$0xff]   ;;  %v3240_v51 = vld [vmem:[%s4782_s30] ss:$0 sm:$0xff]  ;;  %vm986_vm5 = vcmask 64512   ;;  %s3925_s23 = smov 96   ;;  %s3926_s29 = smov 64  }
 0x109   : > { %3443 = vmatpush3.bf16.msra.mxu1 %v3724_v45  ;;  %v868_v20 = vand.u32 127, %v867_v19  ;;  %v3927_v22 = vmov -1e+30   ;;  %vm1125_vm7 = vcmask 195584   ;;  %vm1207_vm8 = vcmask 1043456   ;;  %s3928_s27 = smov 88  }
 0x10a   : > { %3444 = vmatprep.subr.bf16.mxu1 %v3923_v46  ;;  %s3929_s19 = smov 120   ;;  %s3930_s20 = smov 56   ;;  %vm2411_vm9 = vcmask 130048   ;;  %vm3012_vm10 = vcmask 257024  }
 0x10b   : > { %vm869_vm6 = vcmp.lt.s32.totalorder %v868_v20, 17  ;;  %s3931_s24 = smov 80   ;;  %s3932_s22 = smov 112  }
 0x10c   : > { %v4194_v23 = vsel %vm869_vm6, 0.0, %v3927_v22  ;;  %s3933_s18 = smov 48   ;;  %s3934_s3 = smov 72  }
 0x10d   : > { %3445 = vmatpush3.bf16.msra.mxu1 %v3725_v47  ;;  %v865_v50 = vld [vmem:[#allocation2 + $0x10] sm:$0xff]   ;;  %s3935_s30 = smov 104   ;;  %p3313_p6 = scmp.ne.s32.totalorder %s3911_s21, 1 }
 0x110   : > { %3447 = vmatmul.mubr.msk.bf16.vlgmr.msra.gmra.mrb[0].mxu1 %vm909_vm4, %v861_v48 }
 0x111   : > { %3450 = vmatprep.mubr.msk.bf16.mxu1 %vm3924_vm3, %v3923_v46 }
 0x118   : > { %3451 = vmatmul.mubr.msk.bf16.gmra.mrb[4].mxu1 %vm909_vm4, %v863_v49 }
 0x119   : > { %3454 = vmatprep.mubr.msk.bf16.mxu1 %vm3924_vm3, %v3923_v46 }
 0x120   : > { %3455 = vmatmul.mubr.msk.bf16.gmra.mrb[8].mxu1 %vm909_vm4, %v865_v50 }
 0x1e3   : > { %v953_v52 = vpop.f32.mrb[0].mxu1 }
 0x1e4   : > { %v3448_v53 = vpop.f32.mrb[1].mxu1  ;;  %v954_v55 = vadd.f32 %v3240_v51, %v953_v52 }
 0x1e5   : > { %v956_v54 = vpop.f32.mrb[2].mxu1 }
 0x1e6   : > { %v957_v56 = vadd.f32 %v3240_v51, %v956_v54  ;;  %v3449_v57 = vpop.f32.mrb[3].mxu1 }
 0x1e8   : > { %v4164_v58 = vpack.c.bf16 %v957_v56, %v954_v55 }
 0x1ea   : > { %982 = vrot.lane.b32.xlu0 %v4164_v58, %s3925_s23  ;;  %3462 = vmatprep.mubr.msk.bf16.mxu1 %vm986_vm5, %v4164_v58 }
 0x1eb   : > { %v961_v59 = vpop.f32.mrb[4].mxu1 }
 0x1ec   : > { %v962_v60 = vadd.f32 %v3240_v51, %v961_v59  ;;  %v3452_v61 = vpop.f32.mrb[5].mxu1 }
 0x1ed   : > { %v964_v62 = vpop.f32.mrb[6].mxu1 }
 0x1ee   : > { %v4169_v63 = vpack.c.bf16 %v962_v60, %v962_v60  ;;  %v3453_v0 = vpop.f32.mrb[7].mxu1  ;;  %v965_v2 = vadd.f32 %v3240_v51, %v964_v62 }
 0x1f0   : > { %984 = vrot.lane.b32.xlu0 %v4169_v63, %s3925_s23 }
 0x1f3   : > { %v969_v1 = vpop.f32.mrb[8].mxu1 }
 0x1f4   : > { %v970_v3 = vadd.f32 %v3240_v51, %v969_v1  ;;  %v3456_v4 = vpop.f32.mrb[9].mxu1 }
 0x1f5   : > { %v972_v5 = vpop.f32.mrb[10].mxu1 }
 0x1f6   : > { %v4172_v6 = vpack.c.bf16 %v970_v3, %v965_v2  ;;  %v973_v7 = vadd.f32 %v3240_v51, %v972_v5  ;;  %v3457_v8 = vpop.f32.mrb[11].mxu1 }
 0x1f8   : > { %v4174_v9 = vpack.c.bf16 %v973_v7, %v973_v7  ;;  %1049 = vrot.lane.b32.xlu1 %v4172_v6, %s3925_s23  ;;  %3470 = vmatprep.mubr.msk.bf16.mxu0 %vm986_vm5, %v4172_v6 }
 0x1fc   : > { %1051 = vrot.lane.b32.xlu1 %v4174_v9, %s3925_s23  ;;  %s3936_s23 = smov 40  }
 0x200   : > { %1196 = vrot.lane.b32.xlu1 %v4164_v58, %s3926_s29 }
 0x25c   : > { %v983_v10 = vpop.permute.xlu0 %982 }
 0x25d   : > { %3648 = vmatprep.subr.msk.bf16.mxu1 %vm986_vm5, %v983_v10  ;;  %v994_v11 = vsel %vm986_vm5, %v983_v10, 0 }
 0x25e   : > { %3459 = vmatpush3.bf16.xpose.msra.mxu1 %v994_v11 }
 0x262   : > { %v985_v12 = vpop.permute.xlu0 %984 }
 0x263   : > { %3649 = vmatprep.subr.msk.bf16.mxu1 %vm986_vm5, %v985_v12  ;;  %v997_v13 = vsel %vm986_vm5, %v985_v12, 0 }
 0x266   : > { %3461 = vmatpush3.bf16.xpose.msra.mxu1 %v997_v13 }
 0x26a   : > { %v1050_v14 = vpop.permute.xlu1 %1049 }
 0x26b   : > { %3650 = vmatprep.subr.msk.bf16.mxu0 %vm986_vm5, %v1050_v14  ;;  %v1060_v15 = vsel %vm986_vm5, %v1050_v14, 0 }
 0x26c   : > { %3467 = vmatpush3.bf16.xpose.msra.mxu0 %v1060_v15 }
 0x26d   : > { %3463 = vmatmul.mubr.msk.bf16.vlgmr.msra.gmra.mrb[12].mxu1 %vm986_vm5, %v4169_v63 }
 0x26e   : > { %v1052_v16 = vpop.permute.xlu1 %1051 }
 0x26f   : > { %3651 = vmatprep.subr.msk.bf16.mxu0 %vm986_vm5, %v1052_v16  ;;  %v1063_v17 = vsel %vm986_vm5, %v1052_v16, 0 }
 0x272   : > { %v1197_v18 = vpop.permute.xlu1 %1196 }
 0x273   : > { %3474 = vmatprep.subr.bf16.mxu1 %v1197_v18 }
 0x274   : > { %3469 = vmatpush3.bf16.xpose.msra.mxu0 %v1063_v17  ;;  %3475 = vmatpush3.bf16.msra.mxu1 %v1197_v18 }
 0x27b   : > { %3471 = vmatmul.mubr.msk.bf16.vlgmr.msra.gmra.mrb[0].mxu0 %vm986_vm5, %v4174_v9 }
 0x340   : > { %v3464_v21 = vpop.f32.mrb[12].mxu1 }
 0x341   : > { %v1115_v24 = vmul.f32 0.35355338, %v3464_v21  ;;  %v1033_v25 = vpop.f32.mrb[13].mxu1 }
 0x342   : > { %v1113_v26 = vmul.f32 0.35355338, %v1033_v25  ;;  %v3465_v27 = vpop.f32.mrb[14].mxu1 }
 0x343   : > { %v1036_v28 = vpop.f32.mrb[15].mxu1  ;;  %v1121_v29 = vadd.f32 %v1115_v24, %v4194_v23 }
 0x344   : > { %v1114_v30 = vmul.f32 0.35355338, %v1036_v28  ;;  %v1119_v32 = vadd.f32 %v1113_v26, %v4194_v23 }
 0x345   : > { %v1132_v31 = vsel %vm1125_vm7, %v1121_v29, -inf }
 0x346   : > { %1133 = vmax.xlane.f32.xlu0 %v1132_v31  ;;  %v1120_v33 = vadd.f32 %v1114_v30, %v4194_v23  ;;  %v1126_v35 = vsel %vm1125_vm7, %v1119_v32, -inf }
 0x348   : > { %v1129_v34 = vsel %vm1125_vm7, %v1120_v33, -inf }
 0x349   : > { %1130 = vmax.xlane.f32.xlu1 %v1129_v34 }
 0x34a   : > { %1127 = vmax.xlane.f32.xlu0 %v1126_v35 }
 0x34e   : > { %v3472_v36 = vpop.f32.mrb[0].mxu0 }
 0x34f   : > { %v1118_v37 = vmul.f32 0.35355338, %v3472_v36  ;;  %v1099_v38 = vpop.f32.mrb[1].mxu0 }
 0x350   : > { %v1116_v39 = vmul.f32 0.35355338, %v1099_v38  ;;  %v3473_v40 = vpop.f32.mrb[2].mxu0 }
 0x351   : > { %v1102_v41 = vpop.f32.mrb[3].mxu0  ;;  %v1124_v42 = vadd.f32 %v1118_v37, %v4194_v23 }
 0x352   : > { %v1122_v44 = vadd.f32 %v1116_v39, %v4194_v23  ;;  %v1117_v47 = vmul.f32 0.35355338, %v1102_v41 }
 0x353   : > { %v1141_v43 = vsel %vm1125_vm7, %v1124_v42, -inf }
 0x354   : > { %1142 = vmax.xlane.f32.xlu0 %v1141_v43  ;;  %v1135_v45 = vsel %vm1125_vm7, %v1122_v44, -inf  ;;  %v1123_v48 = vadd.f32 %v1117_v47, %v4194_v23 }
 0x356   : > { %v1138_v49 = vsel %vm1125_vm7, %v1123_v48, -inf }
 0x358   : > { %1136 = vmax.xlane.f32.xlu0 %v1135_v45 }
 0x35a   : > { %1259 = vrot.lane.b32.xlu1 %v4172_v6, %s3926_s29 }
 0x36e   : > { %1198 = vrot.lane.b32.xlu0 %v4169_v63, %s3926_s29 }
 0x37e   : > { %1139 = vmax.xlane.f32.xlu1 %v1138_v49 }
 0x38f   : > { %1261 = vrot.lane.b32.xlu1 %v4174_v9, %s3926_s29  ;;  %s3937_s29 = smov 8  }
 0x3d3   : > { %v1134_v50 = vpop.xlane.xlu0 %1133 }
 0x3d4   : > { %v1146_v51 = vsub.f32 %v1121_v29, %v1134_v50 }
 0x3d6   : > { %v1154_v52 = vmul.f32 1.442695, %v1146_v51  ;;  %v1131_v53 = vpop.xlane.xlu1 %1130 }
 0x3d7   : > { %v1145_v54 = vsub.f32 %v1120_v33, %v1131_v53  ;;  %v1128_v55 = vpop.xlane.xlu0 %1127 }
 0x3d8   : > { %3744 = vpow2.f32 %v1154_v52  ;;  %v1144_v56 = vsub.f32 %v1119_v32, %v1128_v55 }
 0x3d9   : > { %v1152_v57 = vmul.f32 1.442695, %v1145_v54 }
 0x3da   : > { %v1150_v59 = vmul.f32 1.442695, %v1144_v56  ;;  %v1260_v8 = vpop.permute.xlu1 %1259 }
 0x3db   : > { %3746 = vpow2.f32 %v1152_v57 }
 0x3dc   : > { %3748 = vpow2.f32 %v1150_v59 }
 0x3e1   : > { %v1143_v60 = vpop.xlane.xlu0 %1142 }
 0x3e2   : > { %v3745_v61 = vpop.eup %3744  ;;  %v1149_v10 = vsub.f32 %v1124_v42, %v1143_v60 }
 0x3e3   : > { %v1168_v62 = vsel %vm1125_vm7, %v3745_v61, 0.0 }
 0x3e4   : > { %1169 = vadd.xlane.f32.xlu1 %v1168_v62  ;;  %v1160_v11 = vmul.f32 1.442695, %v1149_v10 }
 0x3e5   : > { %v3747_v0 = vpop.eup %3746  ;;  %v1137_v1 = vpop.xlane.xlu0 %1136 }
 0x3e6   : > { %v3749_v2 = vpop.eup %3748  ;;  %v1165_v3 = vsel %vm1125_vm7, %v3747_v0, 0.0  ;;  %v1147_v12 = vsub.f32 %v1122_v44, %v1137_v1  ;;  %3750 = vpow2.f32 %v1160_v11 }
 0x3e7   : > { %1166 = vadd.xlane.f32.xlu0 %v1165_v3  ;;  %v1162_v4 = vsel %vm1125_vm7, %v3749_v2, 0.0 }
 0x3e8   : > { %1163 = vadd.xlane.f32.xlu1 %v1162_v4  ;;  %v1156_v15 = vmul.f32 1.442695, %v1147_v12 }
 0x3e9   : > { %v1199_v5 = vpop.permute.xlu0 %1198 }
 0x3ea   : > { %3652 = vmatprep.subr.msk.bf16.mxu1 %vm1207_vm8, %v1199_v5  ;;  %v1209_v7 = vsel %vm1207_vm8, %v1199_v5, 0 }
 0x3eb   : > { %3477 = vmatpush3.bf16.msra.mxu1 %v1209_v7 }
 0x3ec   : > { %3482 = vmatprep.subr.bf16.mxu1 %v1260_v8 }
 0x3f0   : > { %v3751_v17 = vpop.eup %3750 }
 0x3f1   : > { %v1177_v19 = vsel %vm1125_vm7, %v3751_v17, 0.0 }
 0x3f9   : > { %1397 = vrot.lane.b32.xlu1 %v4172_v6, %s3928_s27 }
 0x3fd   : > { %1329 = vrot.lane.b32.xlu0 %v4164_v58, %s3928_s27 }
 0x40b   : > { %v1140_v13 = vpop.xlane.xlu1 %1139 }
 0x40c   : > { %v1148_v14 = vsub.f32 %v1123_v48, %v1140_v13 }
 0x40e   : > { %v1158_v16 = vmul.f32 1.442695, %v1148_v14 }
 0x40f   : > { %v1262_v24 = vpop.permute.xlu1 %1261 }
 0x410   : > { %3752 = vpow2.f32 %v1158_v16  ;;  %v1271_v38 = vsel %vm1207_vm8, %v1262_v24, 0 }
 0x411   : > { %3754 = vpow2.f32 %v1156_v15 }
 0x41a   : > { %v3753_v18 = vpop.eup %3752 }
 0x41b   : > { %v1174_v20 = vsel %vm1125_vm7, %v3753_v18, 0.0  ;;  %v3755_v21 = vpop.eup %3754 }
 0x41c   : > { %1178 = vadd.xlane.f32.xlu0 %v1177_v19  ;;  %v1171_v22 = vsel %vm1125_vm7, %v3755_v21, 0.0 }
 0x41d   : > { %1175 = vadd.xlane.f32.xlu1 %v1174_v20 }
 0x420   : > { %1172 = vadd.xlane.f32.xlu0 %v1171_v22 }
 0x42e   : > { %1399 = vrot.lane.b32.xlu1 %v4174_v9, %s3928_s27 }
 0x432   : > { %1327 = vrot.lane.b32.xlu1 %v4169_v63, %s3929_s19 }
 0x436   : > { %1331 = vrot.lane.b32.xlu0 %v4169_v63, %s3928_s27  ;;  %1395 = vrot.lane.b32.xlu1 %v4174_v9, %s3929_s19  ;;  %s3938_s27 = smov 16  }
 0x43a   : > { %1325 = vrot.lane.b32.xlu0 %v4164_v58, %s3929_s19 }
 0x43e   : > { %1393 = vrot.lane.b32.xlu0 %v4172_v6, %s3929_s19  ;;  %s4783_s19 = sld [smem:[#allocation9_spill]] }
 0x471   : > { %v1170_v25 = vpop.xlane.xlu1 %1169 }
 0x472   : > { %3756 = vrcp.f32 %v1170_v25 }
 0x474   : > { %v1167_v26 = vpop.xlane.xlu0 %1166 }
 0x475   : > { %3758 = vrcp.f32 %v1167_v26  ;;  %v1164_v27 = vpop.xlane.xlu1 %1163 }
 0x476   : > { %3760 = vrcp.f32 %v1164_v27 }
 0x478   : > { %v1330_v28 = vpop.permute.xlu0 %1329 }
 0x479   : > { %3654 = vmatprep.subr.msk.bf16.mxu0 %vm986_vm5, %v1330_v28  ;;  %v1340_v29 = vsel %vm986_vm5, %v1330_v28, 0  ;;  %v1398_v39 = vpop.permute.xlu1 %1397 }
 0x47a   : > { %3491 = vmatpush3.bf16.xpose.msra.mxu0 %v1340_v29  ;;  %v1408_v59 = vsel %vm986_vm5, %v1398_v39, 0 }
 0x47c   : > { %v3757_v30 = vpop.eup %3756 }
 0x47d   : > { %v1188_v34 = vmul.f32 %v3757_v30, %v3745_v61 }
 0x47f   : > { %v3759_v31 = vpop.eup %3758  ;;  %v1193_v37 = vpack.c.bf16 %v1188_v34, %v1188_v34 }
 0x480   : > { %v3761_v32 = vpop.eup %3760  ;;  %v1187_v33 = vmul.f32 %v3759_v31, %v3747_v0 }
 0x481   : > { %v1186_v35 = vmul.f32 %v3761_v32, %v3749_v2 }
 0x483   : > { %v1192_v36 = vpack.c.bf16 %v1187_v33, %v1186_v35 }
 0x485   : > { %3478 = vmatprep.mubr.msk.bf16.mxu1 %vm1125_vm7, %v1192_v36 }
 0x486   : > { %3479 = vmatmul.mubr.msk.bf16.vlgmr.msra.gmra.mrb[16].mxu1 %vm1125_vm7, %v1193_v37 }
 0x487   : > { %3483 = vmatpush3.bf16.msra.mxu1 %v1260_v8 }
 0x488   : > { %3653 = vmatprep.subr.msk.bf16.mxu1 %vm1207_vm8, %v1262_v24 }
 0x48b   : > { %3485 = vmatpush3.bf16.msra.mxu1 %v1271_v38 }
 0x48c   : > { %3656 = vmatprep.subr.msk.bf16.mxu1 %vm986_vm5, %v1398_v39 }
 0x4a9   : > { %v1179_v40 = vpop.xlane.xlu0 %1178 }
 0x4aa   : > { %v1176_v41 = vpop.xlane.xlu1 %1175  ;;  %3762 = vrcp.f32 %v1179_v40 }
 0x4ab   : > { %3764 = vrcp.f32 %v1176_v41 }
 0x4ad   : > { %v1173_v42 = vpop.xlane.xlu0 %1172 }
 0x4ae   : > { %3766 = vrcp.f32 %v1173_v42  ;;  %v1400_v45 = vpop.permute.xlu1 %1399 }
 0x4af   : > { %v1411_v60 = vsel %vm986_vm5, %v1400_v45, 0 }
 0x4b1   : > { %v1332_v43 = vpop.permute.xlu0 %1331 }
 0x4b2   : > { %3655 = vmatprep.subr.msk.bf16.mxu0 %vm986_vm5, %v1332_v43  ;;  %v1343_v44 = vsel %vm986_vm5, %v1332_v43, 0  ;;  %v1328_v52 = vpop.permute.xlu1 %1327 }
 0x4b3   : > { %3493 = vmatpush3.bf16.xpose.msra.mxu0 %v1343_v44 }
 0x4b4   : > { %v3763_v47 = vpop.eup %3762 }
 0x4b5   : > { %v1326_v48 = vpop.permute.xlu0 %1325  ;;  %v3765_v49 = vpop.eup %3764  ;;  %v1191_v51 = vmul.f32 %v3763_v47, %v3751_v17 }
 0x4b6   : > { %3494 = vmatprep.mubr.msk.bf16.mxu0 %vm986_vm5, %v1326_v48  ;;  %v1190_v54 = vmul.f32 %v3765_v49, %v3753_v18  ;;  %v1396_v61 = vpop.permute.xlu1 %1395 }
 0x4b7   : > { %v1195_v56 = vpack.c.bf16 %v1191_v51, %v1191_v51 }
 0x4b8   : > { %v3767_v50 = vpop.eup %3766 }
 0x4b9   : > { %v1189_v53 = vmul.f32 %v3767_v50, %v3755_v21  ;;  %v1394_v57 = vpop.permute.xlu0 %1393 }
 0x4ba   : > { %3495 = vmatmul.mubr.msk.bf16.vlgmr.msra.gmra.mrb[4].mxu0 %vm986_vm5, %v1328_v52 }
 0x4bb   : > { %v1194_v55 = vpack.c.bf16 %v1190_v54, %v1189_v53 }
 0x4bd   : > { %3486 = vmatprep.mubr.msk.bf16.mxu1 %vm1125_vm7, %v1194_v55 }
 0x4be   : > { %3487 = vmatmul.mubr.msk.bf16.vlgmr.msra.gmra.mrb[20].mxu1 %vm1125_vm7, %v1195_v56 }
 0x4bf   : > { %3499 = vmatpush3.bf16.xpose.msra.mxu1 %v1408_v59  ;;  %3502 = vmatprep.mubr.msk.bf16.mxu1 %vm986_vm5, %v1394_v57 }
 0x4c0   : > { %3657 = vmatprep.subr.msk.bf16.mxu1 %vm986_vm5, %v1400_v45 }
 0x4c7   : > { %3501 = vmatpush3.bf16.xpose.msra.mxu1 %v1411_v60 }
 0x4ce   : > { %3503 = vmatmul.mubr.msk.bf16.vlgmr.msra.gmra.mrb[24].mxu1 %vm986_vm5, %v1396_v61 }
 0x559   : > { %v4248_v62 = vpop.f32.mrb[16].mxu1 }
 0x55a   : > { %v4250_v0 = vpop.f32.mrb[17].mxu1 }
 0x55b   : > { %v3481_v1 = vpop.f32.mrb[18].mxu1 }
 0x55c   : > { %v4252_v2 = vpop.f32.mrb[19].mxu1 }
 0x55d   : > { %v1321_v3 = vpack.c.bf16 %v4252_v2, %v4250_v0  ;;  %v1322_v0 = vpack.c.bf16 %v4248_v62, %v4248_v62 }
 0x58d   : > { %v3496_v4 = vpop.f32.mrb[4].mxu0 }
 0x58e   : > { %v1379_v5 = vpop.f32.mrb[5].mxu0  ;;  %v1463_v7 = vmul.f32 0.35355338, %v3496_v4 }
 0x58f   : > { %v1461_v8 = vmul.f32 0.35355338, %v1379_v5  ;;  %v3497_v10 = vpop.f32.mrb[6].mxu0 }
 0x590   : > { %v1382_v11 = vpop.f32.mrb[7].mxu0  ;;  %v1469_v19 = vadd.f32 %v1463_v7, %v4194_v23 }
 0x591   : > { %v1462_v12 = vmul.f32 0.35355338, %v1382_v11  ;;  %v4256_v13 = vpop.f32.mrb[20].mxu1  ;;  %v1467_v14 = vadd.f32 %v1461_v8, %v4194_v23 }
 0x592   : > { %v4259_v15 = vpop.f32.mrb[21].mxu1  ;;  %v1479_v24 = vsel %vm1125_vm7, %v1469_v19, -inf  ;;  %v1324_v62 = vpack.c.bf16 %v4256_v13, %v4256_v13 }
 0x593   : > { %v3489_v16 = vpop.f32.mrb[22].mxu1  ;;  %v1473_v17 = vsel %vm1125_vm7, %v1467_v14, -inf  ;;  %v1468_v18 = vadd.f32 %v1462_v12, %v4194_v23 }
 0x594   : > { %v4264_v20 = vpop.f32.mrb[23].mxu1  ;;  %1474 = vmax.xlane.f32.xlu0 %v1473_v17 }
 0x595   : > { %v1323_v21 = vpack.c.bf16 %v4264_v20, %v4259_v15  ;;  %v1476_v22 = vsel %vm1125_vm7, %v1468_v18, -inf }
 0x596   : > { %1477 = vmax.xlane.f32.xlu1 %v1476_v22 }
 0x598   : > { %1480 = vmax.xlane.f32.xlu0 %v1479_v24 }
 0x5a1   : > { %v3504_v25 = vpop.f32.mrb[24].mxu1 }
 0x5a2   : > { %v1447_v26 = vpop.f32.mrb[25].mxu1  ;;  %v1466_v27 = vmul.f32 0.35355338, %v3504_v25 }
 0x5a3   : > { %v1464_v28 = vmul.f32 0.35355338, %v1447_v26  ;;  %v3505_v29 = vpop.f32.mrb[26].mxu1 }
 0x5a4   : > { %v1450_v30 = vpop.f32.mrb[27].mxu1  ;;  %v1472_v35 = vadd.f32 %v1466_v27, %v4194_v23 }
 0x5a5   : > { %v1465_v31 = vmul.f32 0.35355338, %v1450_v30  ;;  %v1470_v32 = vadd.f32 %v1464_v28, %v4194_v23 }
 0x5a6   : > { %v1488_v37 = vsel %vm1125_vm7, %v1472_v35, -inf }
 0x5a7   : > { %v1482_v33 = vsel %vm1125_vm7, %v1470_v32, -inf  ;;  %v1471_v34 = vadd.f32 %v1465_v31, %v4194_v23 }
 0x5a8   : > { %1483 = vmax.xlane.f32.xlu0 %v1482_v33 }
 0x5a9   : > { %v1485_v36 = vsel %vm1125_vm7, %v1471_v34, -inf }
 0x5aa   : > { %1486 = vmax.xlane.f32.xlu1 %v1485_v36 }
 0x5ac   : > { %1489 = vmax.xlane.f32.xlu0 %v1488_v37 }
 0x621   : > { %v1475_v38 = vpop.xlane.xlu0 %1474 }
 0x622   : > { %v1491_v39 = vsub.f32 %v1467_v14, %v1475_v38 }
 0x623   : > { %v1478_v40 = vpop.xlane.xlu1 %1477 }
 0x624   : > { %v1497_v41 = vmul.f32 1.442695, %v1491_v39  ;;  %v1492_v42 = vsub.f32 %v1468_v18, %v1478_v40 }
 0x625   : > { %v1481_v43 = vpop.xlane.xlu0 %1480 }
 0x626   : > { %3768 = vpow2.f32 %v1497_v41  ;;  %v1499_v44 = vmul.f32 1.442695, %v1492_v42  ;;  %v1493_v45 = vsub.f32 %v1469_v19, %v1481_v43 }
 0x628   : > { %3770 = vpow2.f32 %v1499_v44  ;;  %v1501_v47 = vmul.f32 1.442695, %v1493_v45 }
 0x62a   : > { %3772 = vpow2.f32 %v1501_v47 }
 0x630   : > { %v4276_v48 = vpop.eup %3768 }
 0x631   : > { %v1509_v49 = vsel %vm1125_vm7, %v4276_v48, 0.0 }
 0x632   : > { %v4280_v50 = vpop.eup %3770  ;;  %1510 = vadd.xlane.f32.xlu1 %v1509_v49 }
 0x633   : > { %v1512_v51 = vsel %vm1125_vm7, %v4280_v50, 0.0 }
 0x634   : > { %v4284_v52 = vpop.eup %3772  ;;  %1513 = vadd.xlane.f32.xlu0 %v1512_v51 }
 0x635   : > { %v1515_v53 = vsel %vm1125_vm7, %v4284_v52, 0.0  ;;  %v1484_v54 = vpop.xlane.xlu0 %1483 }
 0x636   : > { %1516 = vadd.xlane.f32.xlu1 %v1515_v53  ;;  %v1494_v57 = vsub.f32 %v1470_v32, %v1484_v54 }
 0x637   : > { %v1487_v60 = vpop.xlane.xlu1 %1486 }
 0x638   : > { %v1503_v61 = vmul.f32 1.442695, %v1494_v57  ;;  %v1495_v1 = vsub.f32 %v1471_v34, %v1487_v60 }
 0x639   : > { %v1490_v55 = vpop.xlane.xlu0 %1489 }
 0x63a   : > { %v1496_v56 = vsub.f32 %v1472_v35, %v1490_v55  ;;  %v1505_v4 = vmul.f32 1.442695, %v1495_v1 }
 0x63c   : > { %v1507_v59 = vmul.f32 1.442695, %v1496_v56 }
 0x63e   : > { %3774 = vpow2.f32 %v1507_v59 }
 0x63f   : > { %3776 = vpow2.f32 %v1503_v61 }
 0x640   : > { %3778 = vpow2.f32 %v1505_v4 }
 0x647   : > { %1543 = vrot.lane.b32.xlu1 %v4164_v58, %s3930_s20 }
 0x648   : > { %v4294_v5 = vpop.eup %3774 }
 0x649   : > { %v1524_v7 = vsel %vm1125_vm7, %v4294_v5, 0.0  ;;  %v4298_v8 = vpop.eup %3776 }
 0x64a   : > { %1545 = vrot.lane.b32.xlu0 %v4169_v63, %s3930_s20  ;;  %v1518_v10 = vsel %vm1125_vm7, %v4298_v8, 0.0  ;;  %v4302_v11 = vpop.eup %3778 }
 0x64b   : > { %1605 = vrot.lane.b32.xlu1 %v4172_v6, %s3930_s20  ;;  %v1521_v12 = vsel %vm1125_vm7, %v4302_v11, 0.0 }
 0x64e   : > { %1675 = vrot.lane.b32.xlu0 %v4164_v58, %s3931_s24 }
 0x64f   : > { %1607 = vrot.lane.b32.xlu1 %v4174_v9, %s3930_s20  ;;  %s3939_s20 = smov 24  }
 0x653   : > { %1743 = vrot.lane.b32.xlu1 %v4172_v6, %s3931_s24 }
 0x66d   : > { %1525 = vadd.xlane.f32.xlu0 %v1524_v7 }
 0x671   : > { %1519 = vadd.xlane.f32.xlu0 %v1518_v10 }
 0x677   : > { %1522 = vadd.xlane.f32.xlu1 %v1521_v12 }
 0x687   : > { %1677 = vrot.lane.b32.xlu0 %v4169_v63, %s3931_s24 }
 0x688   : > { %1745 = vrot.lane.b32.xlu1 %v4174_v9, %s3931_s24 }
 0x68b   : > { %1671 = vrot.lane.b32.xlu0 %v4164_v58, %s3932_s22 }
 0x68c   : > { %1673 = vrot.lane.b32.xlu1 %v4169_v63, %s3932_s22 }
 0x68f   : > { %1739 = vrot.lane.b32.xlu0 %v4172_v6, %s3932_s22 }
 0x690   : > { %1741 = vrot.lane.b32.xlu1 %v4174_v9, %s3932_s22 }
 0x6bf   : > { %v1511_v14 = vpop.xlane.xlu1 %1510 }
 0x6c0   : > { %3780 = vrcp.f32 %v1511_v14 }
 0x6c1   : > { %v1514_v16 = vpop.xlane.xlu0 %1513 }
 0x6c2   : > { %3782 = vrcp.f32 %v1514_v16 }
 0x6c3   : > { %v1517_v17 = vpop.xlane.xlu1 %1516 }
 0x6c4   : > { %3784 = vrcp.f32 %v1517_v17 }
 0x6c5   : > { %v1546_v18 = vpop.permute.xlu0 %1545 }
 0x6c6   : > { %v1555_v26 = vsel %vm1207_vm8, %v1546_v18, 0 }
 0x6c7   : > { %v1544_v19 = vpop.permute.xlu1 %1543 }
 0x6c8   : > { %3506 = vmatprep.subr.bf16.mxu0 %v1544_v19 }
 0x6c9   : > { %3507 = vmatpush3.bf16.msra.mxu0 %v1544_v19  ;;  %v1676_v27 = vpop.permute.xlu0 %1675 }
 0x6ca   : > { %v3781_v22 = vpop.eup %3780  ;;  %3658 = vmatprep.subr.msk.bf16.mxu0 %vm1207_vm8, %v1546_v18  ;;  %v1686_v37 = vsel %vm986_vm5, %v1676_v27, 0 }
 0x6cb   : > { %v1606_v24 = vpop.permute.xlu1 %1605  ;;  %v1533_v28 = vmul.f32 %v3781_v22, %v4276_v48 }
 0x6cc   : > { %v3783_v25 = vpop.eup %3782  ;;  %3514 = vmatprep.subr.bf16.mxu1 %v1606_v24 }
 0x6cd   : > { %3509 = vmatpush3.bf16.msra.mxu0 %v1555_v26  ;;  %3515 = vmatpush3.bf16.msra.mxu1 %v1606_v24  ;;  %v1534_v29 = vmul.f32 %v3783_v25, %v4280_v50 }
 0x6ce   : > { %v3785_v30 = vpop.eup %3784  ;;  %3660 = vmatprep.subr.msk.bf16.mxu0 %vm986_vm5, %v1676_v27 }
 0x6cf   : > { %v1535_v31 = vmul.f32 %v3785_v30, %v4284_v52  ;;  %v1608_v32 = vpop.permute.xlu1 %1607  ;;  %v1539_v33 = vpack.c.bf16 %v1534_v29, %v1533_v28 }
 0x6d0   : > { %v1617_v34 = vsel %vm1207_vm8, %v1608_v32, 0  ;;  %3659 = vmatprep.subr.msk.bf16.mxu1 %vm1207_vm8, %v1608_v32 }
 0x6d1   : > { %3510 = vmatprep.mubr.msk.bf16.mxu0 %vm1125_vm7, %v1539_v33  ;;  %3517 = vmatpush3.bf16.msra.mxu1 %v1617_v34  ;;  %v1540_v35 = vpack.c.bf16 %v1535_v31, %v1535_v31 }
 0x6d3   : > { %3511 = vmatmul.mubr.msk.bf16.vlgmr.msra.gmra.mrb[8].mxu0 %vm1125_vm7, %v1540_v35  ;;  %v1744_v36 = vpop.permute.xlu1 %1743 }
 0x6d4   : > { %3662 = vmatprep.subr.msk.bf16.mxu1 %vm986_vm5, %v1744_v36  ;;  %v1754_v55 = vsel %vm986_vm5, %v1744_v36, 0 }
 0x6d6   : > { %3523 = vmatpush3.bf16.xpose.msra.mxu0 %v1686_v37 }
 0x6fa   : > { %v1526_v38 = vpop.xlane.xlu0 %1525 }
 0x6fb   : > { %3786 = vrcp.f32 %v1526_v38 }
 0x6fe   : > { %v1520_v39 = vpop.xlane.xlu0 %1519 }
 0x6ff   : > { %3788 = vrcp.f32 %v1520_v39 }
 0x702   : > { %v1678_v40 = vpop.permute.xlu0 %1677 }
 0x703   : > { %v1689_v41 = vsel %vm986_vm5, %v1678_v40, 0  ;;  %3661 = vmatprep.subr.msk.bf16.mxu0 %vm986_vm5, %v1678_v40 }
 0x704   : > { %3525 = vmatpush3.bf16.xpose.msra.mxu0 %v1689_v41  ;;  %v1523_v42 = vpop.xlane.xlu1 %1522 }
 0x705   : > { %3790 = vrcp.f32 %v1523_v42  ;;  %v3787_v45 = vpop.eup %3786 }
 0x706   : > { %v1672_v43 = vpop.permute.xlu0 %1671  ;;  %v1538_v50 = vmul.f32 %v3787_v45, %v4294_v5 }
 0x707   : > { %3526 = vmatprep.mubr.msk.bf16.mxu0 %vm986_vm5, %v1672_v43 }
 0x708   : > { %v1746_v44 = vpop.permute.xlu1 %1745  ;;  %v1542_v54 = vpack.c.bf16 %v1538_v50, %v1538_v50 }
 0x709   : > { %v3789_v48 = vpop.eup %3788  ;;  %v1757_v57 = vsel %vm986_vm5, %v1746_v44, 0 }
 0x70a   : > { %v1536_v51 = vmul.f32 %v3789_v48, %v4298_v8  ;;  %v1740_v56 = vpop.permute.xlu0 %1739 }
 0x70c   : > { %v1674_v47 = vpop.permute.xlu1 %1673 }
 0x70d   : > { %3527 = vmatmul.mubr.msk.bf16.vlgmr.msra.gmra.mrb[12].mxu0 %vm986_vm5, %v1674_v47 }
 0x70f   : > { %v3791_v49 = vpop.eup %3790 }
 0x710   : > { %v1537_v52 = vmul.f32 %v3791_v49, %v4302_v11  ;;  %v1742_v59 = vpop.permute.xlu1 %1741 }
 0x712   : > { %v1541_v53 = vpack.c.bf16 %v1537_v52, %v1536_v51 }
 0x714   : > { %3518 = vmatprep.mubr.msk.bf16.mxu1 %vm1125_vm7, %v1541_v53 }
 0x715   : > { %3519 = vmatmul.mubr.msk.bf16.vlgmr.msra.gmra.mrb[28].mxu1 %vm1125_vm7, %v1542_v54 }
 0x716   : > { %3531 = vmatpush3.bf16.xpose.msra.mxu1 %v1754_v55  ;;  %3534 = vmatprep.mubr.msk.bf16.mxu1 %vm986_vm5, %v1740_v56 }
 0x717   : > { %3663 = vmatprep.subr.msk.bf16.mxu1 %vm986_vm5, %v1746_v44 }
 0x71e   : > { %3533 = vmatpush3.bf16.xpose.msra.mxu1 %v1757_v57 }
 0x725   : > { %3535 = vmatmul.mubr.msk.bf16.vlgmr.msra.gmra.mrb[32].mxu1 %vm986_vm5, %v1742_v59 }
 0x7a6   : > { %v4338_v60 = vpop.f32.mrb[8].mxu0 }
 0x7a7   : > { %v4340_v61 = vpop.f32.mrb[9].mxu0 }
 0x7a8   : > { %v3513_v1 = vpop.f32.mrb[10].mxu0 }
 0x7a9   : > { %v4342_v4 = vpop.f32.mrb[11].mxu0 }
 0x7aa   : > { %v1667_v5 = vpack.c.bf16 %v4342_v4, %v4340_v61 }
 0x7e0   : > { %v3528_v7 = vpop.f32.mrb[12].mxu0 }
 0x7e1   : > { %v1725_v8 = vpop.f32.mrb[13].mxu0  ;;  %v1809_v10 = vmul.f32 0.35355338, %v3528_v7 }
 0x7e2   : > { %v1807_v11 = vmul.f32 0.35355338, %v1725_v8  ;;  %v3529_v12 = vpop.f32.mrb[14].mxu0 }
 0x7e3   : > { %v1728_v14 = vpop.f32.mrb[15].mxu0  ;;  %v1815_v22 = vadd.f32 %v1809_v10, %v4194_v23 }
 0x7e4   : > { %v1808_v16 = vmul.f32 0.35355338, %v1728_v14  ;;  %v1813_v17 = vadd.f32 %v1807_v11, %v4194_v23 }
 0x7e5   : > { %v1825_v28 = vsel %vm1125_vm7, %v1815_v22, -inf }
 0x7e6   : > { %v1819_v18 = vsel %vm1125_vm7, %v1813_v17, -inf  ;;  %v1814_v19 = vadd.f32 %v1808_v16, %v4194_v23 }
 0x7e7   : > { %1820 = vmax.xlane.f32.xlu0 %v1819_v18 }
 0x7e8   : > { %v4350_v24 = vpop.f32.mrb[28].mxu1  ;;  %v1822_v25 = vsel %vm1125_vm7, %v1814_v19, -inf }
 0x7e9   : > { %v4353_v26 = vpop.f32.mrb[29].mxu1  ;;  %1823 = vmax.xlane.f32.xlu1 %v1822_v25 }
 0x7ea   : > { %v3521_v27 = vpop.f32.mrb[30].mxu1 }
 0x7eb   : > { %v4356_v29 = vpop.f32.mrb[31].mxu1  ;;  %1826 = vmax.xlane.f32.xlu0 %v1825_v28 }
 0x7ec   : > { %v1669_v30 = vpack.c.bf16 %v4356_v29, %v4353_v26 }
 0x7f8   : > { %v3536_v31 = vpop.f32.mrb[32].mxu1 }
 0x7f9   : > { %v1793_v32 = vpop.f32.mrb[33].mxu1  ;;  %v1812_v33 = vmul.f32 0.35355338, %v3536_v31 }
 0x7fa   : > { %v1810_v34 = vmul.f32 0.35355338, %v1793_v32  ;;  %v3537_v35 = vpop.f32.mrb[34].mxu1 }
 0x7fb   : > { %v1796_v36 = vpop.f32.mrb[35].mxu1  ;;  %v1818_v41 = vadd.f32 %v1812_v33, %v4194_v23 }
 0x7fc   : > { %v1811_v37 = vmul.f32 0.35355338, %v1796_v36  ;;  %v1816_v38 = vadd.f32 %v1810_v34, %v4194_v23 }
 0x7fd   : > { %v1834_v43 = vsel %vm1125_vm7, %v1818_v41, -inf }
 0x7fe   : > { %v1828_v39 = vsel %vm1125_vm7, %v1816_v38, -inf  ;;  %v1817_v40 = vadd.f32 %v1811_v37, %v4194_v23 }
 0x7ff   : > { %1829 = vmax.xlane.f32.xlu0 %v1828_v39 }
 0x800   : > { %v1831_v42 = vsel %vm1125_vm7, %v1817_v40, -inf }
 0x801   : > { %1832 = vmax.xlane.f32.xlu1 %v1831_v42 }
 0x803   : > { %1835 = vmax.xlane.f32.xlu0 %v1834_v43 }
 0x874   : > { %v1821_v44 = vpop.xlane.xlu0 %1820 }
 0x875   : > { %v1837_v45 = vsub.f32 %v1813_v17, %v1821_v44 }
 0x876   : > { %v1824_v47 = vpop.xlane.xlu1 %1823 }
 0x877   : > { %v1843_v48 = vmul.f32 1.442695, %v1837_v45  ;;  %v1838_v49 = vsub.f32 %v1814_v19, %v1824_v47 }
 0x878   : > { %v1827_v50 = vpop.xlane.xlu0 %1826 }
 0x879   : > { %3792 = vpow2.f32 %v1843_v48  ;;  %v1845_v51 = vmul.f32 1.442695, %v1838_v49  ;;  %v1839_v52 = vsub.f32 %v1815_v22, %v1827_v50 }
 0x87b   : > { %3794 = vpow2.f32 %v1845_v51  ;;  %v1847_v53 = vmul.f32 1.442695, %v1839_v52 }
 0x87d   : > { %3796 = vpow2.f32 %v1847_v53 }
 0x883   : > { %v4366_v54 = vpop.eup %3792 }
 0x884   : > { %v1855_v55 = vsel %vm1125_vm7, %v4366_v54, 0.0 }
 0x885   : > { %v4370_v56 = vpop.eup %3794  ;;  %1856 = vadd.xlane.f32.xlu1 %v1855_v55 }
 0x886   : > { %v1858_v57 = vsel %vm1125_vm7, %v4370_v56, 0.0 }
 0x887   : > { %v4374_v59 = vpop.eup %3796  ;;  %1859 = vadd.xlane.f32.xlu0 %v1858_v57 }
 0x888   : > { %v1861_v1 = vsel %vm1125_vm7, %v4374_v59, 0.0 }
 0x889   : > { %1862 = vadd.xlane.f32.xlu1 %v1861_v1 }
 0x88c   : > { %v1830_v7 = vpop.xlane.xlu0 %1829 }
 0x88d   : > { %v1840_v11 = vsub.f32 %v1816_v38, %v1830_v7 }
 0x88e   : > { %v1833_v14 = vpop.xlane.xlu1 %1832 }
 0x88f   : > { %v1849_v16 = vmul.f32 1.442695, %v1840_v11  ;;  %v1841_v17 = vsub.f32 %v1817_v40, %v1833_v14 }
 0x890   : > { %v1836_v8 = vpop.xlane.xlu0 %1835 }
 0x891   : > { %v1842_v10 = vsub.f32 %v1818_v41, %v1836_v8  ;;  %v1851_v18 = vmul.f32 1.442695, %v1841_v17 }
 0x893   : > { %v1853_v12 = vmul.f32 1.442695, %v1842_v10 }
 0x895   : > { %3798 = vpow2.f32 %v1853_v12 }
 0x896   : > { %3800 = vpow2.f32 %v1849_v16 }
 0x897   : > { %3802 = vpow2.f32 %v1851_v18 }
 0x89a   : > { %1889 = vrot.lane.b32.xlu1 %v4164_v58, %s3933_s18 }
 0x89d   : > { %1891 = vrot.lane.b32.xlu0 %v4169_v63, %s3933_s18 }
 0x89e   : > { %1951 = vrot.lane.b32.xlu1 %v4172_v6, %s3933_s18 }
 0x89f   : > { %v4384_v19 = vpop.eup %3798 }
 0x8a0   : > { %v1870_v22 = vsel %vm1125_vm7, %v4384_v19, 0.0  ;;  %v4388_v25 = vpop.eup %3800 }
 0x8a1   : > { %2021 = vrot.lane.b32.xlu0 %v4164_v58, %s3934_s3  ;;  %v1864_v27 = vsel %vm1125_vm7, %v4388_v25, 0.0  ;;  %v4392_v28 = vpop.eup %3802 }
 0x8a2   : > { %1953 = vrot.lane.b32.xlu1 %v4174_v9, %s3933_s18  ;;  %v1867_v31 = vsel %vm1125_vm7, %v4392_v28, 0.0  ;;  %s4784_s18 = scalar_lea.vmem %s4751_s7, %s4050_s26 }
 0x8a3   : > { %v3281_v13 = vld [vmem:[%s4784_s18] ss:$0 sm:$0xff] }
 0x8a6   : > { %2089 = vrot.lane.b32.xlu1 %v4172_v6, %s3934_s3 }
 0x8c0   : > { %1871 = vadd.xlane.f32.xlu0 %v1870_v22 }
 0x8c4   : > { %1865 = vadd.xlane.f32.xlu0 %v1864_v27 }
 0x8ca   : > { %1868 = vadd.xlane.f32.xlu1 %v1867_v31 }
 0x8da   : > { %2023 = vrot.lane.b32.xlu0 %v4169_v63, %s3934_s3 }
 0x8db   : > { %2091 = vrot.lane.b32.xlu1 %v4174_v9, %s3934_s3 }
 0x8de   : > { %2017 = vrot.lane.b32.xlu0 %v4164_v58, %s3935_s30 }
 0x8df   : > { %2019 = vrot.lane.b32.xlu1 %v4169_v63, %s3935_s30 }
 0x8e2   : > { %2085 = vrot.lane.b32.xlu0 %v4172_v6, %s3935_s30 }
 0x8e3   : > { %2087 = vrot.lane.b32.xlu1 %v4174_v9, %s3935_s30  ;;  %s4785_s30 = scalar_lea.vmem %s4752_s8, %s4050_s26 }
 0x912   : > { %v1857_v32 = vpop.xlane.xlu1 %1856 }
 0x913   : > { %3804 = vrcp.f32 %v1857_v32 }
 0x914   : > { %v1860_v33 = vpop.xlane.xlu0 %1859 }
 0x915   : > { %3806 = vrcp.f32 %v1860_v33 }
 0x916   : > { %v1863_v34 = vpop.xlane.xlu1 %1862 }
 0x917   : > { %3808 = vrcp.f32 %v1863_v34 }
 0x918   : > { %v1892_v35 = vpop.permute.xlu0 %1891 }
 0x919   : > { %v1901_v40 = vsel %vm1207_vm8, %v1892_v35, 0 }
 0x91a   : > { %v1890_v36 = vpop.permute.xlu1 %1889 }
 0x91b   : > { %3538 = vmatprep.subr.bf16.mxu0 %v1890_v36 }
 0x91c   : > { %3539 = vmatpush3.bf16.msra.mxu0 %v1890_v36  ;;  %v2022_v41 = vpop.permute.xlu0 %2021 }
 0x91d   : > { %v3805_v37 = vpop.eup %3804  ;;  %3664 = vmatprep.subr.msk.bf16.mxu0 %vm1207_vm8, %v1892_v35  ;;  %v2032_v52 = vsel %vm986_vm5, %v2022_v41, 0 }
 0x91e   : > { %v1952_v38 = vpop.permute.xlu1 %1951  ;;  %v1879_v42 = vmul.f32 %v3805_v37, %v4366_v54 }
 0x91f   : > { %v3807_v39 = vpop.eup %3806  ;;  %3546 = vmatprep.subr.bf16.mxu1 %v1952_v38 }
 0x920   : > { %3541 = vmatpush3.bf16.msra.mxu0 %v1901_v40  ;;  %3547 = vmatpush3.bf16.msra.mxu1 %v1952_v38  ;;  %v1880_v43 = vmul.f32 %v3807_v39, %v4370_v56 }
 0x921   : > { %v3809_v44 = vpop.eup %3808  ;;  %3666 = vmatprep.subr.msk.bf16.mxu0 %vm986_vm5, %v2022_v41 }
 0x922   : > { %v1881_v45 = vmul.f32 %v3809_v44, %v4374_v59  ;;  %v1954_v47 = vpop.permute.xlu1 %1953  ;;  %v1885_v48 = vpack.c.bf16 %v1880_v43, %v1879_v42 }
 0x923   : > { %v1963_v49 = vsel %vm1207_vm8, %v1954_v47, 0  ;;  %3665 = vmatprep.subr.msk.bf16.mxu1 %vm1207_vm8, %v1954_v47 }
 0x924   : > { %3542 = vmatprep.mubr.msk.bf16.mxu0 %vm1125_vm7, %v1885_v48  ;;  %3549 = vmatpush3.bf16.msra.mxu1 %v1963_v49  ;;  %v1886_v50 = vpack.c.bf16 %v1881_v45, %v1881_v45 }
 0x926   : > { %3543 = vmatmul.mubr.msk.bf16.vlgmr.msra.gmra.mrb[16].mxu0 %vm1125_vm7, %v1886_v50  ;;  %v2090_v51 = vpop.permute.xlu1 %2089 }
 0x927   : > { %3668 = vmatprep.subr.msk.bf16.mxu1 %vm986_vm5, %v2090_v51  ;;  %v2100_v22 = vsel %vm986_vm5, %v2090_v51, 0 }
 0x929   : > { %3555 = vmatpush3.bf16.xpose.msra.mxu0 %v2032_v52 }
 0x94d   : > { %v1872_v53 = vpop.xlane.xlu0 %1871 }
 0x94e   : > { %3810 = vrcp.f32 %v1872_v53 }
 0x951   : > { %v1866_v54 = vpop.xlane.xlu0 %1865 }
 0x952   : > { %3812 = vrcp.f32 %v1866_v54 }
 0x955   : > { %v2024_v55 = vpop.permute.xlu0 %2023 }
 0x956   : > { %v2035_v56 = vsel %vm986_vm5, %v2024_v55, 0  ;;  %3667 = vmatprep.subr.msk.bf16.mxu0 %vm986_vm5, %v2024_v55 }
 0x957   : > { %3557 = vmatpush3.bf16.xpose.msra.mxu0 %v2035_v56  ;;  %v1869_v57 = vpop.xlane.xlu1 %1868 }
 0x958   : > { %3814 = vrcp.f32 %v1869_v57  ;;  %v3811_v7 = vpop.eup %3810 }
 0x959   : > { %v2018_v59 = vpop.permute.xlu0 %2017  ;;  %v1884_v12 = vmul.f32 %v3811_v7, %v4384_v19 }
 0x95a   : > { %3558 = vmatprep.mubr.msk.bf16.mxu0 %vm986_vm5, %v2018_v59 }
 0x95b   : > { %v2092_v1 = vpop.permute.xlu1 %2091  ;;  %v1888_v18 = vpack.c.bf16 %v1884_v12, %v1884_v12 }
 0x95c   : > { %v3813_v10 = vpop.eup %3812  ;;  %v2103_v19 = vsel %vm986_vm5, %v2092_v1, 0 }
 0x95d   : > { %v1882_v14 = vmul.f32 %v3813_v10, %v4388_v25  ;;  %v2086_v27 = vpop.permute.xlu0 %2085 }
 0x95f   : > { %v2020_v8 = vpop.permute.xlu1 %2019 }
 0x960   : > { %3559 = vmatmul.mubr.msk.bf16.vlgmr.msra.gmra.mrb[20].mxu0 %vm986_vm5, %v2020_v8 }
 0x962   : > { %v3815_v11 = vpop.eup %3814 }
 0x963   : > { %v1883_v16 = vmul.f32 %v3815_v11, %v4392_v28  ;;  %v2088_v25 = vpop.permute.xlu1 %2087 }
 0x965   : > { %v1887_v17 = vpack.c.bf16 %v1883_v16, %v1882_v14 }
 0x967   : > { %3550 = vmatprep.mubr.msk.bf16.mxu1 %vm1125_vm7, %v1887_v17 }
 0x968   : > { %3551 = vmatmul.mubr.msk.bf16.vlgmr.msra.gmra.mrb[36].mxu1 %vm1125_vm7, %v1888_v18 }
 0x969   : > { %3563 = vmatpush3.bf16.xpose.msra.mxu1 %v2100_v22  ;;  %3566 = vmatprep.mubr.msk.bf16.mxu1 %vm986_vm5, %v2086_v27 }
 0x96a   : > { %3669 = vmatprep.subr.msk.bf16.mxu1 %vm986_vm5, %v2092_v1 }
 0x971   : > { %3565 = vmatpush3.bf16.xpose.msra.mxu1 %v2103_v19 }
 0x978   : > { %3567 = vmatmul.mubr.msk.bf16.vlgmr.msra.gmra.mrb[40].mxu1 %vm986_vm5, %v2088_v25 }
 0x9f9   : > { %v4428_v28 = vpop.f32.mrb[16].mxu0 }
 0x9fa   : > { %v4430_v31 = vpop.f32.mrb[17].mxu0  ;;  %v2014_v61 = vpack.c.bf16 %v4428_v28, %v4428_v28 }
 0x9fb   : > { %v3545_v32 = vpop.f32.mrb[18].mxu0 }
 0x9fc   : > { %v4432_v33 = vpop.f32.mrb[19].mxu0 }
 0x9fd   : > { %v2013_v34 = vpack.c.bf16 %v4432_v33, %v4430_v31 }
 0xa33   : > { %v3560_v35 = vpop.f32.mrb[20].mxu0 }
 0xa34   : > { %v2071_v36 = vpop.f32.mrb[21].mxu0  ;;  %v2155_v37 = vmul.f32 0.35355338, %v3560_v35 }
 0xa35   : > { %v2153_v38 = vmul.f32 0.35355338, %v2071_v36  ;;  %v3561_v39 = vpop.f32.mrb[22].mxu0 }
 0xa36   : > { %v2074_v40 = vpop.f32.mrb[23].mxu0  ;;  %v2161_v45 = vadd.f32 %v2155_v37, %v4194_v23 }
 0xa37   : > { %v2154_v41 = vmul.f32 0.35355338, %v2074_v40  ;;  %v2159_v42 = vadd.f32 %v2153_v38, %v4194_v23 }
 0xa38   : > { %v2171_v51 = vsel %vm1125_vm7, %v2161_v45, -inf }
 0xa39   : > { %v2165_v43 = vsel %vm1125_vm7, %v2159_v42, -inf  ;;  %v2160_v44 = vadd.f32 %v2154_v41, %v4194_v23 }
 0xa3a   : > { %2166 = vmax.xlane.f32.xlu0 %v2165_v43 }
 0xa3b   : > { %v4440_v47 = vpop.f32.mrb[36].mxu1  ;;  %v2168_v48 = vsel %vm1125_vm7, %v2160_v44, -inf }
 0xa3c   : > { %v4443_v49 = vpop.f32.mrb[37].mxu1  ;;  %2169 = vmax.xlane.f32.xlu1 %v2168_v48 }
 0xa3d   : > { %v3553_v50 = vpop.f32.mrb[38].mxu1 }
 0xa3e   : > { %v4446_v52 = vpop.f32.mrb[39].mxu1  ;;  %2172 = vmax.xlane.f32.xlu0 %v2171_v51 }
 0xa3f   : > { %v2015_v53 = vpack.c.bf16 %v4446_v52, %v4443_v49 }
 0xa4b   : > { %v3568_v54 = vpop.f32.mrb[40].mxu1 }
 0xa4c   : > { %v2139_v55 = vpop.f32.mrb[41].mxu1  ;;  %v2158_v56 = vmul.f32 0.35355338, %v3568_v54 }
 0xa4d   : > { %v2156_v57 = vmul.f32 0.35355338, %v2139_v55  ;;  %v3569_v59 = vpop.f32.mrb[42].mxu1 }
 0xa4e   : > { %v2142_v1 = vpop.f32.mrb[43].mxu1  ;;  %v2164_v12 = vadd.f32 %v2158_v56, %v4194_v23 }
 0xa4f   : > { %v2157_v7 = vmul.f32 0.35355338, %v2142_v1  ;;  %v2162_v8 = vadd.f32 %v2156_v57, %v4194_v23 }
 0xa50   : > { %v2180_v16 = vsel %vm1125_vm7, %v2164_v12, -inf }
 0xa51   : > { %v2174_v10 = vsel %vm1125_vm7, %v2162_v8, -inf  ;;  %v2163_v11 = vadd.f32 %v2157_v7, %v4194_v23 }
 0xa52   : > { %2175 = vmax.xlane.f32.xlu0 %v2174_v10 }
 0xa53   : > { %v2177_v14 = vsel %vm1125_vm7, %v2163_v11, -inf }
 0xa54   : > { %2178 = vmax.xlane.f32.xlu1 %v2177_v14 }
 0xa56   : > { %2181 = vmax.xlane.f32.xlu0 %v2180_v16 }
 0xac7   : > { %v2167_v17 = vpop.xlane.xlu0 %2166 }
 0xac8   : > { %v2183_v18 = vsub.f32 %v2159_v42, %v2167_v17 }
 0xac9   : > { %v2170_v22 = vpop.xlane.xlu1 %2169 }
 0xaca   : > { %v2189_v27 = vmul.f32 1.442695, %v2183_v18  ;;  %v2184_v19 = vsub.f32 %v2160_v44, %v2170_v22 }
 0xacb   : > { %v2173_v25 = vpop.xlane.xlu0 %2172 }
 0xacc   : > { %3816 = vpow2.f32 %v2189_v27  ;;  %v2191_v32 = vmul.f32 1.442695, %v2184_v19  ;;  %v2185_v35 = vsub.f32 %v2161_v45, %v2173_v25 }
 0xace   : > { %3818 = vpow2.f32 %v2191_v32  ;;  %v2193_v36 = vmul.f32 1.442695, %v2185_v35 }
 0xad0   : > { %3820 = vpow2.f32 %v2193_v36 }
 0xad6   : > { %v3817_v23 = vpop.eup %3816 }
 0xad7   : > { %v2201_v37 = vsel %vm1125_vm7, %v3817_v23, 0.0 }
 0xad8   : > { %v3819_v38 = vpop.eup %3818  ;;  %2202 = vadd.xlane.f32.xlu1 %v2201_v37 }
 0xad9   : > { %v2204_v39 = vsel %vm1125_vm7, %v3819_v38, 0.0 }
 0xada   : > { %v3821_v40 = vpop.eup %3820  ;;  %2205 = vadd.xlane.f32.xlu0 %v2204_v39 }
 0xadb   : > { %v2207_v41 = vsel %vm1125_vm7, %v3821_v40, 0.0 }
 0xadc   : > { %2208 = vadd.xlane.f32.xlu1 %v2207_v41  ;;  %v3730_v41 = vld [vmem:[%s4783_s19 + $0x8] sm:$0xff]  }
 0xadf   : > { %v2176_v42 = vpop.xlane.xlu0 %2175 }
 0xae0   : > { %v2186_v43 = vsub.f32 %v2162_v8, %v2176_v42 }
 0xae1   : > { %v2179_v57 = vpop.xlane.xlu1 %2178 }
 0xae2   : > { %v2195_v45 = vmul.f32 1.442695, %v2186_v43  ;;  %v2187_v59 = vsub.f32 %v2163_v11, %v2179_v57 }
 0xae3   : > { %v2182_v44 = vpop.xlane.xlu0 %2181 }
 0xae4   : > { %v2188_v48 = vsub.f32 %v2164_v12, %v2182_v44  ;;  %v2197_v1 = vmul.f32 1.442695, %v2187_v59 }
 0xae6   : > { %v2199_v50 = vmul.f32 1.442695, %v2188_v48 }
 0xae8   : > { %3822 = vpow2.f32 %v2199_v50 }
 0xae9   : > { %3824 = vpow2.f32 %v2195_v45 }
 0xaea   : > { %3826 = vpow2.f32 %v2197_v1  ;;  %v2016_v1 = vpack.c.bf16 %v4440_v47, %v4440_v47 }
 0xaed   : > { %2235 = vrot.lane.b32.xlu1 %v4164_v58, %s3936_s23 }
 0xaf1   : > { %2297 = vrot.lane.b32.xlu1 %v4172_v6, %s3936_s23 }
 0xaf2   : > { %v4461_v51 = vpop.eup %3822 }
 0xaf3   : > { %v2216_v54 = vsel %vm1125_vm7, %v4461_v51, 0.0  ;;  %v4465_v55 = vpop.eup %3824 }
 0xaf4   : > { %2217 = vadd.xlane.f32.xlu0 %v2216_v54  ;;  %v2210_v56 = vsel %vm1125_vm7, %v4465_v55, 0.0  ;;  %v3827_v58 = vpop.eup %3826 }
 0xaf5   : > { %v2213_v6 = vsel %vm1125_vm7, %v3827_v58, 0.0 }
 0xaf8   : > { %2211 = vadd.xlane.f32.xlu0 %v2210_v56 }
 0xb0e   : > { %2237 = vrot.lane.b32.xlu0 %v4169_v63, %s3936_s23  ;;  %v1668_v63 = vpack.c.bf16 %v4338_v60, %v4338_v60 }
 0xb12   : > { %2367 = vrot.lane.b32.xlu0 %v1667_v5, %s3937_s29 }
 0xb15   : > { %2214 = vadd.xlane.f32.xlu1 %v2213_v6 }
 0xb26   : > { %2299 = vrot.lane.b32.xlu1 %v4174_v9, %s3936_s23 }
 0xb2a   : > { %2379 = vrot.lane.b32.xlu1 %v2013_v34, %s3938_s27 }
 0xb2e   : > { %2369 = vrot.lane.b32.xlu1 %v1668_v63, %s3937_s29 }
 0xb32   : > { %2381 = vrot.lane.b32.xlu1 %v2014_v61, %s3938_s27 }
 0xb65   : > { %v2203_v4 = vpop.xlane.xlu1 %2202 }
 0xb66   : > { %3828 = vrcp.f32 %v2203_v4 }
 0xb67   : > { %v2206_v5 = vpop.xlane.xlu0 %2205 }
 0xb68   : > { %3830 = vrcp.f32 %v2206_v5 }
 0xb69   : > { %v2209_v9 = vpop.xlane.xlu1 %2208 }
 0xb6a   : > { %3832 = vrcp.f32 %v2209_v9 }
 0xb6d   : > { %v2236_v7 = vpop.permute.xlu1 %2235 }
 0xb6e   : > { %3570 = vmatprep.subr.bf16.mxu0 %v2236_v7 }
 0xb6f   : > { %3571 = vmatpush3.bf16.msra.mxu0 %v2236_v7 }
 0xb70   : > { %v3829_v31 = vpop.eup %3828 }
 0xb71   : > { %v2298_v33 = vpop.permute.xlu1 %2297  ;;  %v2225_v60 = vmul.f32 %v3829_v31, %v3817_v23 }
 0xb72   : > { %v3831_v34 = vpop.eup %3830  ;;  %3578 = vmatprep.subr.bf16.mxu1 %v2298_v33 }
 0xb73   : > { %3579 = vmatpush3.bf16.msra.mxu1 %v2298_v33  ;;  %v2226_v8 = vmul.f32 %v3831_v34, %v3819_v38 }
 0xb74   : > { %v3833_v11 = vpop.eup %3832 }
 0xb75   : > { %v2231_v10 = vpack.c.bf16 %v2226_v8, %v2225_v60  ;;  %v2227_v14 = vmul.f32 %v3833_v11, %v3821_v40  ;;  %v3729_v40 = vld [vmem:[%s4783_s19] sm:$0xff]   ;;  %s4786_s19 = scalar_lea.vmem %s4753_s9, %s4050_s26 }
 0xb77   : > { %3574 = vmatprep.mubr.msk.bf16.mxu0 %vm1125_vm7, %v2231_v10  ;;  %v2232_v18 = vpack.c.bf16 %v2227_v14, %v2227_v14 }
 0xb81   : > { %v2218_v28 = vpop.xlane.xlu0 %2217 }
 0xb82   : > { %3834 = vrcp.f32 %v2218_v28 }
 0xb85   : > { %v2212_v12 = vpop.xlane.xlu0 %2211 }
 0xb86   : > { %3836 = vrcp.f32 %v2212_v12  ;;  %v3864_v12 = vld [vmem:[#allocation2] sm:$0xff]  }
 0xb87   : > { %v2530_v14 = vunpack.c.l.bf16 %v3864_v12 }
 0xb89   : > { %v2238_v16 = vpop.permute.xlu0 %2237 }
 0xb8a   : > { %v2247_v17 = vsel %vm1207_vm8, %v2238_v16, 0  ;;  %3670 = vmatprep.subr.msk.bf16.mxu0 %vm1207_vm8, %v2238_v16 }
 0xb8b   : > { %3573 = vmatpush3.bf16.msra.mxu0 %v2247_v17 }
 0xb8c   : > { %3586 = vmatprep.subr.bf16.mxu0 %v3923_v46  ;;  %v3835_v25 = vpop.eup %3834 }
 0xb8d   : > { %v2230_v36 = vmul.f32 %v3835_v25, %v4461_v51  ;;  %v1670_v51 = vpack.c.bf16 %v4350_v24, %v4350_v24  ;;  %v2368_v26 = vpop.permute.xlu0 %2367 }
 0xb8e   : > { %3575 = vmatmul.mubr.msk.bf16.vlgmr.msra.gmra.mrb[24].mxu0 %vm1125_vm7, %v2232_v18 }
 0xb8f   : > { %3590 = vmatprep.mubr.msk.bf16.mxu0 %vm3924_vm3, %v3923_v46  ;;  %v2234_v39 = vpack.c.bf16 %v2230_v36, %v2230_v36  ;;  %3587 = vmatpush3.bf16.msra.mxu0 %v3729_v40 }
 0xb90   : > { %v3837_v32 = vpop.eup %3836  ;;  %3588 = vmatprep.subr.bf16.mxu0 %v3923_v46 }
 0xb91   : > { %v2228_v23 = vmul.f32 %v3837_v32, %v4465_v55 }
 0xb93   : > { %3589 = vmatpush3.bf16.msra.mxu0 %v3730_v41 }
 0xb94   : > { %3618 = vmatprep.subr.bf16.mxu0 %v3923_v46 }
 0xba2   : > { %v2215_v22 = vpop.xlane.xlu1 %2214 }
 0xba3   : > { %3838 = vrcp.f32 %v2215_v22  ;;  %v2531_v22 = vunpack.c.h.bf16 %v3864_v12 }
 0xba6   : > { %v2300_v27 = vpop.permute.xlu1 %2299 }
 0xba7   : > { %v2309_v19 = vsel %vm1207_vm8, %v2300_v27, 0  ;;  %3671 = vmatprep.subr.msk.bf16.mxu1 %vm1207_vm8, %v2300_v27 }
 0xba8   : > { %3581 = vmatpush3.bf16.msra.mxu1 %v2309_v19 }
 0xba9   : > { %3602 = vmatprep.subr.bf16.mxu1 %v3923_v46 }
 0xbaa   : > { %v2380_v29 = vpop.permute.xlu1 %2379 }
 0xbad   : > { %v3839_v35 = vpop.eup %3838 }
 0xbae   : > { %v2229_v37 = vmul.f32 %v3839_v35, %v3827_v58  ;;  %v2370_v47 = vpop.permute.xlu1 %2369 }
 0xbaf   : > { %v2404_v2 = vsel %vm986_vm5, %v1322_v0, %v2370_v47 }
 0xbb0   : > { %v2233_v38 = vpack.c.bf16 %v2229_v37, %v2228_v23  ;;  %v3865_v37 = vld [vmem:[#allocation2 + $0x8] sm:$0xff]  }
 0xbb2   : > { %3582 = vmatprep.mubr.msk.bf16.mxu1 %vm1125_vm7, %v2233_v38  ;;  %v2382_v6 = vpop.permute.xlu1 %2381  ;;  %v2532_v38 = vunpack.c.l.bf16 %v3865_v37 }
 0xbb3   : > { %3583 = vmatmul.mubr.msk.bf16.vlgmr.msra.gmra.mrb[44].mxu1 %vm1125_vm7, %v2234_v39  ;;  %v2415_v4 = vsel %vm2411_vm9, %v2404_v2, %v2382_v6 }
 0xbb4   : > { %3606 = vmatprep.mubr.msk.bf16.mxu1 %vm3924_vm3, %v3923_v46 }
 0xc61   : > { %v3576_v42 = vpop.f32.mrb[24].mxu0 }
 0xc62   : > { %v2360_v43 = vpack.c.bf16 %v3576_v42, %v3576_v42  ;;  %v2283_v44 = vpop.f32.mrb[25].mxu0  ;;  %v2533_v42 = vunpack.c.h.bf16 %v3865_v37  ;;  %v3738_v37 = vld [vmem:[%s4092_s16 + $0x28] sm:$0xff]  }
 0xc63   : > { %v3577_v48 = vpop.f32.mrb[26].mxu0 }
 0xc64   : > { %2393 = vrot.lane.b32.xlu1 %v2360_v43, %s3939_s20  ;;  %v2286_v45 = vpop.f32.mrb[27].mxu0 }
 0xc65   : > { %v2359_v50 = vpack.c.bf16 %v2286_v45, %v2283_v44 }
 0xc67   : > { %2391 = vrot.lane.b32.xlu0 %v2359_v50, %s3939_s20 }
 0xc68   : > { %2373 = vrot.lane.b32.xlu1 %v1670_v51, %s3937_s29 }
 0xc6b   : > { %2371 = vrot.lane.b32.xlu0 %v1669_v30, %s3937_s29  ;;  %v2401_v30 = vsel %vm986_vm5, %v1321_v3, %v2368_v26 }
 0xc6c   : > { %v2413_v49 = vsel %vm2411_vm9, %v2401_v30, %v2380_v29 }
 0xc6f   : > { %2383 = vrot.lane.b32.xlu0 %v2015_v53, %s3938_s27 }
 0xc86   : > { %v3584_v54 = vpop.f32.mrb[44].mxu1 }
 0xc87   : > { %v2362_v55 = vpack.c.bf16 %v3584_v54, %v3584_v54  ;;  %v2345_v56 = vpop.f32.mrb[45].mxu1  ;;  %v3866_v54 = vld [vmem:[#allocation2 + $0x10] sm:$0xff]  }
 0xc88   : > { %v3585_v57 = vpop.f32.mrb[46].mxu1 }
 0xc89   : > { %2397 = vrot.lane.b32.xlu1 %v2362_v55, %s3939_s20  ;;  %v2348_v59 = vpop.f32.mrb[47].mxu1  ;;  %v2534_v55 = vunpack.c.l.bf16 %v3866_v54 }
 0xc8a   : > { %v2361_v24 = vpack.c.bf16 %v2348_v59, %v2345_v56 }
 0xc8c   : > { %2395 = vrot.lane.b32.xlu0 %v2361_v24, %s3939_s20 }
 0xc90   : > { %2385 = vrot.lane.b32.xlu0 %v2016_v1, %s3938_s27  ;;  %v2535_v1 = vunpack.c.h.bf16 %v3866_v54 }
 0xcd6   : > { %v2394_v63 = vpop.permute.xlu1 %2393 }
 0xcd7   : > { %v2423_v7 = vsel %vm1125_vm7, %v2415_v4, %v2394_v63 }
 0xcd9   : > { %v2392_v52 = vpop.permute.xlu0 %2391 }
 0xcda   : > { %v2421_v53 = vsel %vm1125_vm7, %v2413_v49, %v2392_v52  ;;  %v2374_v31 = vpop.permute.xlu1 %2373 }
 0xcdb   : > { %3591 = vmatmul.mubr.msk.bf16.vlgmr.msra.gmra.mrb[28].mxu0 %vm909_vm4, %v2421_v53  ;;  %v2410_v60 = vsel %vm986_vm5, %v1324_v62, %v2374_v31  ;;  %v3732_v62 = vld [vmem:[%s4082_s4 + $0x8] sm:$0xff]  }
 0xcdc   : > { %3594 = vmatprep.mubr.msk.bf16.mxu0 %vm3924_vm3, %v3923_v46 }
 0xcdd   : > { %v2372_v58 = vpop.permute.xlu0 %2371 }
 0xcde   : > { %v2407_v3 = vsel %vm986_vm5, %v1323_v21, %v2372_v58 }
 0xce1   : > { %v2384_v61 = vpop.permute.xlu0 %2383 }
 0xce2   : > { %v2417_v5 = vsel %vm2411_vm9, %v2407_v3, %v2384_v61 }
 0xcfb   : > { %v2398_v20 = vpop.permute.xlu1 %2397 }
 0xcfe   : > { %v2396_v9 = vpop.permute.xlu0 %2395 }
 0xcff   : > { %v2425_v33 = vsel %vm1125_vm7, %v2417_v5, %v2396_v9 }
 0xd00   : > { %v3282_v34 = vcombine.low %v2423_v7, %v2425_v33  ;;  %v2436_v10 = vunpack.c.h.b16 %v2425_v33  ;;  %v3731_v7 = vld [vmem:[%s4082_s4] sm:$0xff]  }
 0xd01   : > { %3603 = vmatpush3.bf16.msra.mxu1 %v3731_v7 }
 0xd02   : > { %v2386_v15 = vpop.permute.xlu0 %2385  ;;  %3595 = vmatmul.mubr.msk.bf16.gmra.mrb[32].mxu0 %vm909_vm4, %v3282_v34  ;;  %3604 = vmatprep.subr.bf16.mxu1 %v3923_v46 }
 0xd03   : > { %v2419_v21 = vsel %vm2411_vm9, %v2410_v60, %v2386_v15  ;;  %3598 = vmatprep.mubr.msk.bf16.mxu0 %vm3924_vm3, %v3923_v46 }
 0xd04   : > { %v2427_v8 = vsel %vm1125_vm7, %v2419_v21, %v2398_v20 }
 0xd05   : > { %v2437_v28 = vunpack.c.l.b16 %v2427_v8  ;;  %3605 = vmatpush3.bf16.msra.mxu1 %v3732_v62 }
 0xd07   : > { %v2451_v11 = vpack.c.b16 %v2437_v28, %v2436_v10 }
 0xd0a   : > { %3599 = vmatmul.mubr.msk.bf16.gmra.mrb[36].mxu0 %vm909_vm4, %v2451_v11 }
 0xd0b   : > { %3634 = vmatprep.mubr.msk.bf16.mxu0 %vm3924_vm3, %v3923_v46 }
 0xdae   : > { %v2507_v16 = vpop.f32.mrb[28].mxu0 }
 0xdaf   : > { %v2508_v17 = vadd.f32 %v3281_v13, %v2507_v16  ;;  %v3592_v18 = vpop.f32.mrb[29].mxu0 }
 0xdb0   : > { %v2510_v27 = vpop.f32.mrb[30].mxu0 }
 0xdb1   : > { %v2536_v19 = vadd.f32 %v2530_v14, %v2508_v17  ;;  %v2511_v25 = vadd.f32 %v3281_v13, %v2510_v27  ;;  %v3593_v32 = vpop.f32.mrb[31].mxu0 }
 0xdb2   : > { %v3734_v32 = vld [vmem:[%s4092_s16 + $0x8] sm:$0xff]  }
 0xdb3   : > { %v2537_v35 = vadd.f32 %v2531_v22, %v2511_v25  ;;  %v2544_v36 = vsel %vm909_vm4, %v2536_v19, 0.0  ;;  %v3733_v25 = vld [vmem:[%s4092_s16] sm:$0xff]  }
 0xdb4   : > { %2545 = vadd.xlane.f32.xlu0 %v2544_v36  ;;  %3619 = vmatpush3.bf16.msra.mxu0 %v3733_v25  ;;  %v3736_v36 = vld [vmem:[%s4092_s16 + $0x18] sm:$0xff]  }
 0xdb5   : > { %v2547_v23 = vsel %vm909_vm4, %v2537_v35, 0.0  ;;  %3620 = vmatprep.subr.bf16.mxu0 %v3923_v46 }
 0xdb6   : > { %2548 = vadd.xlane.f32.xlu1 %v2547_v23  ;;  %v3737_v23 = vld [vmem:[%s4092_s16 + $0x20] sm:$0xff]  }
 0xdb8   : > { %3621 = vmatpush3.bf16.msra.mxu0 %v3734_v32 }
 0xdb9   : > { %3622 = vmatprep.subr.bf16.mxu0 %v3923_v46 }
 0xdd5   : > { %v2515_v39 = vpop.f32.mrb[32].mxu0 }
 0xdd6   : > { %v2516_v40 = vadd.f32 %v3281_v13, %v2515_v39  ;;  %v3596_v41 = vpop.f32.mrb[33].mxu0 }
 0xdd7   : > { %v2518_v43 = vpop.f32.mrb[34].mxu0 }
 0xdd8   : > { %v2538_v44 = vadd.f32 %v2532_v38, %v2516_v40  ;;  %v2519_v48 = vadd.f32 %v3281_v13, %v2518_v43  ;;  %v3597_v45 = vpop.f32.mrb[35].mxu0 }
 0xdda   : > { %v2539_v50 = vadd.f32 %v2533_v42, %v2519_v48  ;;  %v2550_v51 = vsel %vm909_vm4, %v2538_v44, 0.0  ;;  %v3288_v48 = vld [vmem:[%s4785_s30] ss:$0 sm:$0xff] }
 0xddb   : > { %2551 = vadd.xlane.f32.xlu0 %v2550_v51 }
 0xddc   : > { %v2553_v24 = vsel %vm909_vm4, %v2539_v50, 0.0 }
 0xddd   : > { %v2523_v56 = vpop.f32.mrb[36].mxu0 }
 0xdde   : > { %v2524_v57 = vadd.f32 %v3281_v13, %v2523_v56  ;;  %v3600_v59 = vpop.f32.mrb[37].mxu0 }
 0xddf   : > { %2554 = vadd.xlane.f32.xlu0 %v2553_v24  ;;  %v2526_v26 = vpop.f32.mrb[38].mxu0 }
 0xde0   : > { %v2540_v29 = vadd.f32 %v2534_v55, %v2524_v57  ;;  %v2527_v30 = vadd.f32 %v3281_v13, %v2526_v26  ;;  %v3601_v49 = vpop.f32.mrb[39].mxu0  ;;  %v3289_v55 = vld [vmem:[%s4786_s19] ss:$0 sm:$0xff] }
 0xde2   : > { %v2541_v52 = vadd.f32 %v2535_v1, %v2527_v30  ;;  %v2556_v53 = vsel %vm909_vm4, %v2540_v29, 0.0 }
 0xde3   : > { %2557 = vadd.xlane.f32.xlu1 %v2556_v53 }
 0xde4   : > { %v2559_v47 = vsel %vm909_vm4, %v2541_v52, 0.0 }
 0xde5   : > { %2560 = vadd.xlane.f32.xlu0 %v2559_v47 }
 0xe41   : > { %v2546_v58 = vpop.xlane.xlu0 %2545 }
 0xe42   : > { %v2563_v6 = vmul.f32 0.03125, %v2546_v58 }
 0xe43   : > { %v2549_v63 = vpop.xlane.xlu1 %2548 }
 0xe44   : > { %v4562_v61 = vsub.f32 %v2536_v19, %v2563_v6  ;;  %v2564_v0 = vmul.f32 0.03125, %v2549_v63 }
 0xe46   : > { %v4564_v2 = vsub.f32 %v2537_v35, %v2564_v0  ;;  %v2575_v3 = vmul.f32 %v4562_v61, %v4562_v61  ;;  %v3735_v35 = vld [vmem:[%s4092_s16 + $0x10] sm:$0xff]  }
 0xe47   : > { %3623 = vmatpush3.bf16.msra.mxu0 %v3735_v35 }
 0xe48   : > { %v2581_v4 = vsel %vm909_vm4, %v2575_v3, 0.0  ;;  %v2576_v5 = vmul.f32 %v4564_v2, %v4564_v2  ;;  %3624 = vmatprep.subr.bf16.mxu0 %v3923_v46 }
 0xe49   : > { %2582 = vadd.xlane.f32.xlu1 %v2581_v4 }
 0xe4a   : > { %v2584_v9 = vsel %vm909_vm4, %v2576_v5, 0.0 }
 0xe4b   : > { %2585 = vadd.xlane.f32.xlu0 %v2584_v9  ;;  %3625 = vmatpush3.bf16.msra.mxu0 %v3736_v36 }
 0xe4c   : > { %3626 = vmatprep.subr.bf16.mxu0 %v3923_v46 }
 0xe4f   : > { %3627 = vmatpush3.bf16.msra.mxu0 %v3737_v23 }
 0xe50   : > { %3628 = vmatprep.subr.bf16.mxu0 %v3923_v46 }
 0xe53   : > { %3629 = vmatpush3.bf16.msra.mxu0 %v3738_v37 }
 0xe54   : > { %3630 = vmatprep.subr.bf16.mxu0 %v3923_v46 }
 0xe68   : > { %v2552_v31 = vpop.xlane.xlu0 %2551 }
 0xe69   : > { %v2565_v33 = vmul.f32 0.03125, %v2552_v31 }
 0xe6b   : > { %v4575_v34 = vsub.f32 %v2538_v44, %v2565_v33 }
 0xe6c   : > { %v2555_v60 = vpop.xlane.xlu0 %2554 }
 0xe6d   : > { %v2566_v15 = vmul.f32 0.03125, %v2555_v60  ;;  %v2577_v20 = vmul.f32 %v4575_v34, %v4575_v34 }
 0xe6f   : > { %v4579_v21 = vsub.f32 %v2539_v50, %v2566_v15  ;;  %v2587_v8 = vsel %vm909_vm4, %v2577_v20, 0.0 }
 0xe70   : > { %2588 = vadd.xlane.f32.xlu1 %v2587_v8  ;;  %v2558_v10 = vpop.xlane.xlu1 %2557 }
 0xe71   : > { %v2567_v28 = vmul.f32 0.03125, %v2558_v10  ;;  %v2578_v11 = vmul.f32 %v4579_v21, %v4579_v21 }
 0xe72   : > { %v2561_v13 = vpop.xlane.xlu0 %2560 }
 0xe73   : > { %v4584_v12 = vsub.f32 %v2540_v29, %v2567_v28  ;;  %v2568_v14 = vmul.f32 0.03125, %v2561_v13  ;;  %v2590_v16 = vsel %vm909_vm4, %v2578_v11, 0.0  ;;  %v3739_v11 = vld [vmem:[%s4092_s16 + $0x30] sm:$0xff]   ;;  %v3740_v13 = vld [vmem:[%s4092_s16 + $0x38] sm:$0xff]  }
 0xe74   : > { %2591 = vadd.xlane.f32.xlu0 %v2590_v16  ;;  %3631 = vmatpush3.bf16.msra.mxu0 %v3739_v11 }
 0xe75   : > { %v4587_v17 = vsub.f32 %v2541_v52, %v2568_v14  ;;  %v2579_v18 = vmul.f32 %v4584_v12, %v4584_v12  ;;  %3632 = vmatprep.subr.bf16.mxu0 %v3923_v46 }
 0xe77   : > { %v2593_v22 = vsel %vm909_vm4, %v2579_v18, 0.0  ;;  %v2580_v27 = vmul.f32 %v4587_v17, %v4587_v17 }
 0xe78   : > { %2594 = vadd.xlane.f32.xlu1 %v2593_v22  ;;  %3633 = vmatpush3.bf16.msra.mxu0 %v3740_v13 }
 0xe79   : > { %v2596_v19 = vsel %vm909_vm4, %v2580_v27, 0.0 }
 0xe7a   : > { %2597 = vadd.xlane.f32.xlu0 %v2596_v19 }
 0xed6   : > { %v2583_v38 = vpop.xlane.xlu1 %2582 }
 0xed7   : > { %v2599_v39 = vmul.f32 0.03125, %v2583_v38 }
 0xed8   : > { %v2586_v40 = vpop.xlane.xlu0 %2585 }
 0xed9   : > { %v2605_v41 = vadd.f32 1e-05, %v2599_v39  ;;  %v2600_v42 = vmul.f32 0.03125, %v2586_v40 }
 0xedb   : > { %3840 = vrsqrt.f32 %v2605_v41  ;;  %v2606_v43 = vadd.f32 1e-05, %v2600_v42 }
 0xedd   : > { %3842 = vrsqrt.f32 %v2606_v43 }
 0xee5   : > { %v3841_v44 = vpop.eup %3840 }
 0xee6   : > { %v2617_v45 = vmul.f32 %v3841_v44, %v4562_v61 }
 0xee7   : > { %v3843_v50 = vpop.eup %3842 }
 0xee8   : > { %v2629_v51 = vmul.f32 %v3288_v48, %v2617_v45  ;;  %v2618_v54 = vmul.f32 %v3843_v50, %v4564_v2 }
 0xeea   : > { %v2630_v56 = vmul.f32 %v3288_v48, %v2618_v54  ;;  %v4619_v57 = vadd.f32 %v3289_v55, %v2629_v51 }
 0xeec   : > { %v4621_v59 = vadd.f32 %v3289_v55, %v2630_v56 }
 0xeee   : > { %v2647_v24 = vpack.c.bf16 %v4621_v59, %v4619_v57 }
 0xef0   : > { %3607 = vmatmul.mubr.msk.bf16.vlgmr.msra.gmra.mrb[48].mxu1 %vm909_vm4, %v2647_v24  ;;  %v3296_v24 = vld [vmem:[%s715_s28] ss:$0 sm:$0xff] }
 0xef1   : > { %3610 = vmatprep.mubr.msk.bf16.mxu1 %vm3924_vm3, %v3923_v46 }
 0xefd   : > { %v2589_v1 = vpop.xlane.xlu1 %2588 }
 0xefe   : > { %v2601_v26 = vmul.f32 0.03125, %v2589_v1 }
 0xf00   : > { %v2607_v29 = vadd.f32 1e-05, %v2601_v26 }
 0xf01   : > { %v2592_v30 = vpop.xlane.xlu0 %2591 }
 0xf02   : > { %3844 = vrsqrt.f32 %v2607_v29  ;;  %v2602_v49 = vmul.f32 0.03125, %v2592_v30 }
 0xf04   : > { %v2608_v52 = vadd.f32 1e-05, %v2602_v49 }
 0xf05   : > { %v2595_v53 = vpop.xlane.xlu1 %2594 }
 0xf06   : > { %3846 = vrsqrt.f32 %v2608_v52  ;;  %v2603_v47 = vmul.f32 0.03125, %v2595_v53 }
 0xf07   : > { %v2598_v58 = vpop.xlane.xlu0 %2597 }
 0xf08   : > { %v2609_v6 = vadd.f32 1e-05, %v2603_v47  ;;  %v2604_v63 = vmul.f32 0.03125, %v2598_v58 }
 0xf0a   : > { %3848 = vrsqrt.f32 %v2609_v6  ;;  %v2610_v61 = vadd.f32 1e-05, %v2604_v63 }
 0xf0c   : > { %v3845_v0 = vpop.eup %3844  ;;  %3850 = vrsqrt.f32 %v2610_v61 }
 0xf0d   : > { %v2619_v2 = vmul.f32 %v3845_v0, %v4575_v34 }
 0xf0f   : > { %v2631_v5 = vmul.f32 %v3288_v48, %v2619_v2 }
 0xf10   : > { %v3847_v3 = vpop.eup %3846 }
 0xf11   : > { %v2620_v4 = vmul.f32 %v3847_v3, %v4579_v21  ;;  %v4631_v33 = vadd.f32 %v3289_v55, %v2631_v5 }
 0xf13   : > { %v2632_v9 = vmul.f32 %v3288_v48, %v2620_v4 }
 0xf14   : > { %v3849_v7 = vpop.eup %3848 }
 0xf15   : > { %v2621_v31 = vmul.f32 %v3849_v7, %v4584_v12  ;;  %v4633_v62 = vadd.f32 %v3289_v55, %v2632_v9  ;;  %v3290_v12 = vld [vmem:[%s707_s6] ss:$0 sm:$0xff] }
 0xf16   : > { %v3851_v60 = vpop.eup %3850 }
 0xf17   : > { %v2622_v15 = vmul.f32 %v3851_v60, %v4587_v17  ;;  %v2648_v34 = vpack.c.bf16 %v4633_v62, %v4631_v33  ;;  %v2633_v20 = vmul.f32 %v3288_v48, %v2621_v31 }
 0xf19   : > { %3611 = vmatmul.mubr.msk.bf16.gmra.mrb[52].mxu1 %vm909_vm4, %v2648_v34  ;;  %v2634_v21 = vmul.f32 %v3288_v48, %v2622_v15  ;;  %v4643_v10 = vadd.f32 %v3289_v55, %v2633_v20 }
 0xf1a   : > { %3614 = vmatprep.mubr.msk.bf16.mxu1 %vm3924_vm3, %v3923_v46 }
 0xf1b   : > { %v4641_v8 = vadd.f32 %v3289_v55, %v2634_v21 }
 0xf1d   : > { %v2649_v28 = vpack.c.bf16 %v4641_v8, %v4643_v10 }
 0xf21   : > { %3615 = vmatmul.mubr.msk.bf16.gmra.mrb[56].mxu1 %vm909_vm4, %v2649_v28 }
 0xfc3   : > { %v2716_v14 = vpop.f32.mrb[48].mxu1 }
 0xfc4   : > { %v2717_v16 = vadd.f32 %v3290_v12, %v2716_v14  ;;  %v3608_v17 = vpop.f32.mrb[49].mxu1 }
 0xfc5   : > { %v2719_v18 = vpop.f32.mrb[50].mxu1 }
 0xfc6   : > { %v2720_v22 = vadd.f32 %v3290_v12, %v2719_v18  ;;  %v3609_v27 = vpop.f32.mrb[51].mxu1  ;;  %v2739_v19 = vmax.f32 %v2717_v16, 0.0 }
 0xfc8   : > { %v2740_v25 = vmax.f32 %v2720_v22, 0.0 }
 0xfca   : > { %v2745_v32 = vpack.c.bf16 %v2740_v25, %v2739_v19 }
 0xfcc   : > { %3635 = vmatmul.mubr.bf16.vlgmr.msra.gmra.mrb[40].mxu0 %v2745_v32 }
 0xfcd   : > { %3638 = vmatprep.mubr.msk.bf16.mxu0 %vm3924_vm3, %v3923_v46 }
 0xfec   : > { %v2724_v35 = vpop.f32.mrb[52].mxu1 }
 0xfed   : > { %v2725_v36 = vadd.f32 %v3290_v12, %v2724_v35  ;;  %v3612_v23 = vpop.f32.mrb[53].mxu1 }
 0xfee   : > { %v2727_v37 = vpop.f32.mrb[54].mxu1 }
 0xfef   : > { %v2728_v38 = vadd.f32 %v3290_v12, %v2727_v37  ;;  %v3613_v39 = vpop.f32.mrb[55].mxu1  ;;  %v2741_v40 = vmax.f32 %v2725_v36, 0.0 }
 0xff1   : > { %v2742_v41 = vmax.f32 %v2728_v38, 0.0 }
 0xff3   : > { %v2746_v42 = vpack.c.bf16 %v2742_v41, %v2741_v40 }
 0xff4   : > { %v2732_v43 = vpop.f32.mrb[56].mxu1 }
 0xff5   : > { %v2733_v44 = vadd.f32 %v3290_v12, %v2732_v43  ;;  %v3616_v48 = vpop.f32.mrb[57].mxu1  ;;  %3639 = vmatmul.mubr.bf16.gmra.mrb[44].mxu0 %v2746_v42 }
 0xff6   : > { %v2735_v45 = vpop.f32.mrb[58].mxu1  ;;  %3642 = vmatprep.mubr.msk.bf16.mxu0 %vm3924_vm3, %v3923_v46 }
 0xff7   : > { %v2736_v50 = vadd.f32 %v3290_v12, %v2735_v45  ;;  %v3617_v51 = vpop.f32.mrb[59].mxu1  ;;  %v2743_v54 = vmax.f32 %v2733_v44, 0.0 }
 0xff9   : > { %v2744_v55 = vmax.f32 %v2736_v50, 0.0 }
 0xffb   : > { %v2747_v56 = vpack.c.bf16 %v2744_v55, %v2743_v54 }
 0xffd   : > { %3643 = vmatmul.mubr.bf16.gmra.mrb[48].mxu0 %v2747_v56 }
0x109f   : > { %v2853_v1 = vpop.f32.mrb[40].mxu0 }
0x10a0   : > { %v2854_v26 = vadd.f32 %v3296_v24, %v2853_v1  ;;  %v3636_v29 = vpop.f32.mrb[41].mxu0 }
0x10a1   : > { %v2856_v30 = vpop.f32.mrb[42].mxu0 }
0x10a2   : > { %v2876_v49 = vadd.f32 %v2854_v26, %v4619_v57  ;;  %v2857_v52 = vadd.f32 %v3296_v24, %v2856_v30  ;;  %v3637_v53 = vpop.f32.mrb[43].mxu0  ;;  %v3305_v30 = vld [vmem:[%s718_s0] ss:$0 sm:$0xff] }
0x10a3   : > { %v3306_v53 = vld [vmem:[%s721_s2] ss:$0 sm:$0xff] }
0x10a4   : > { %v2877_v46 = vadd.f32 %v2857_v52, %v4621_v59  ;;  %v2884_v47 = vsel %vm909_vm4, %v2876_v49, 0.0 }
0x10a5   : > { %2885 = vadd.xlane.f32.xlu1 %v2884_v47 }
0x10a6   : > { %v2887_v58 = vsel %vm909_vm4, %v2877_v46, 0.0 }
0x10a7   : > { %2888 = vadd.xlane.f32.xlu0 %v2887_v58 }
0x10c8   : > { %v2861_v6 = vpop.f32.mrb[44].mxu0 }
0x10c9   : > { %v2862_v63 = vadd.f32 %v3296_v24, %v2861_v6  ;;  %v3640_v61 = vpop.f32.mrb[45].mxu0 }
0x10ca   : > { %v2864_v0 = vpop.f32.mrb[46].mxu0 }
0x10cb   : > { %v2878_v2 = vadd.f32 %v2862_v63, %v4631_v33  ;;  %v2865_v3 = vadd.f32 %v3296_v24, %v2864_v0  ;;  %v3641_v4 = vpop.f32.mrb[47].mxu0 }
0x10cd   : > { %v2879_v57 = vadd.f32 %v2865_v3, %v4633_v62  ;;  %v2890_v5 = vsel %vm909_vm4, %v2878_v2, 0.0 }
0x10ce   : > { %2891 = vadd.xlane.f32.xlu1 %v2890_v5 }
0x10cf   : > { %v2893_v59 = vsel %vm909_vm4, %v2879_v57, 0.0 }
0x10d0   : > { %2894 = vadd.xlane.f32.xlu0 %v2893_v59  ;;  %v2869_v9 = vpop.f32.mrb[48].mxu0 }
0x10d1   : > { %v2870_v7 = vadd.f32 %v3296_v24, %v2869_v9  ;;  %v3644_v31 = vpop.f32.mrb[49].mxu0 }
0x10d2   : > { %v2872_v60 = vpop.f32.mrb[50].mxu0 }
0x10d3   : > { %v2880_v15 = vadd.f32 %v2870_v7, %v4643_v10  ;;  %v2873_v34 = vadd.f32 %v3296_v24, %v2872_v60  ;;  %v3645_v20 = vpop.f32.mrb[51].mxu0 }
0x10d5   : > { %v2881_v33 = vadd.f32 %v2873_v34, %v4641_v8  ;;  %v2896_v21 = vsel %vm909_vm4, %v2880_v15, 0.0 }
0x10d6   : > { %2897 = vadd.xlane.f32.xlu1 %v2896_v21 }
0x10d7   : > { %v2899_v62 = vsel %vm909_vm4, %v2881_v33, 0.0 }
0x10d8   : > { %2900 = vadd.xlane.f32.xlu0 %v2899_v62 }
0x1132   : > { %v2886_v28 = vpop.xlane.xlu1 %2885 }
0x1133   : > { %v2902_v11 = vmul.f32 0.03125, %v2886_v28 }
0x1134   : > { %v2889_v13 = vpop.xlane.xlu0 %2888 }
0x1135   : > { %v2908_v12 = vsub.f32 %v2876_v49, %v2902_v11  ;;  %v2903_v14 = vmul.f32 0.03125, %v2889_v13 }
0x1137   : > { %v2909_v16 = vsub.f32 %v2877_v46, %v2903_v14  ;;  %v2914_v17 = vmul.f32 %v2908_v12, %v2908_v12 }
0x1139   : > { %v2920_v18 = vsel %vm909_vm4, %v2914_v17, 0.0  ;;  %v2915_v10 = vmul.f32 %v2909_v16, %v2909_v16 }
0x113a   : > { %2921 = vadd.xlane.f32.xlu1 %v2920_v18 }
0x113b   : > { %v2923_v22 = vsel %vm909_vm4, %v2915_v10, 0.0 }
0x113c   : > { %2924 = vadd.xlane.f32.xlu0 %v2923_v22 }
0x115b   : > { %v2892_v8 = vpop.xlane.xlu1 %2891 }
0x115c   : > { %v2904_v27 = vmul.f32 0.03125, %v2892_v8 }
0x115d   : > { %v2895_v19 = vpop.xlane.xlu0 %2894 }
0x115e   : > { %v2910_v25 = vsub.f32 %v2878_v2, %v2904_v27  ;;  %v2905_v32 = vmul.f32 0.03125, %v2895_v19 }
0x1160   : > { %v2911_v35 = vsub.f32 %v2879_v57, %v2905_v32  ;;  %v2916_v36 = vmul.f32 %v2910_v25, %v2910_v25 }
0x1162   : > { %v2926_v23 = vsel %vm909_vm4, %v2916_v36, 0.0  ;;  %v2917_v37 = vmul.f32 %v2911_v35, %v2911_v35 }
0x1163   : > { %2927 = vadd.xlane.f32.xlu1 %v2926_v23  ;;  %v2898_v38 = vpop.xlane.xlu1 %2897 }
0x1164   : > { %v2906_v39 = vmul.f32 0.03125, %v2898_v38  ;;  %v2929_v40 = vsel %vm909_vm4, %v2917_v37, 0.0 }
0x1165   : > { %2930 = vadd.xlane.f32.xlu0 %v2929_v40  ;;  %v2901_v41 = vpop.xlane.xlu0 %2900 }
0x1166   : > { %v2912_v42 = vsub.f32 %v2880_v15, %v2906_v39  ;;  %v2907_v43 = vmul.f32 0.03125, %v2901_v41 }
0x1168   : > { %v2913_v44 = vsub.f32 %v2881_v33, %v2907_v43  ;;  %v2918_v48 = vmul.f32 %v2912_v42, %v2912_v42 }
0x116a   : > { %v2932_v45 = vsel %vm909_vm4, %v2918_v48, 0.0  ;;  %v2919_v50 = vmul.f32 %v2913_v44, %v2913_v44 }
0x116b   : > { %2933 = vadd.xlane.f32.xlu1 %v2932_v45 }
0x116c   : > { %v2935_v51 = vsel %vm909_vm4, %v2919_v50, 0.0 }
0x116d   : > { %2936 = vadd.xlane.f32.xlu0 %v2935_v51 }
0x11c7   : > { %v2922_v54 = vpop.xlane.xlu1 %2921 }
0x11c8   : > { %v2938_v55 = vmul.f32 0.03125, %v2922_v54 }
0x11c9   : > { %v2925_v56 = vpop.xlane.xlu0 %2924 }
0x11ca   : > { %v2944_v24 = vadd.f32 1e-05, %v2938_v55  ;;  %v2939_v1 = vmul.f32 0.03125, %v2925_v56 }
0x11cc   : > { %3852 = vrsqrt.f32 %v2944_v24  ;;  %v2945_v26 = vadd.f32 1e-05, %v2939_v1 }
0x11ce   : > { %3854 = vrsqrt.f32 %v2945_v26 }
0x11d6   : > { %v3853_v29 = vpop.eup %3852 }
0x11d7   : > { %v2956_v49 = vmul.f32 %v3853_v29, %v2908_v12 }
0x11d8   : > { %v3855_v52 = vpop.eup %3854 }
0x11d9   : > { %v2968_v46 = vmul.f32 %v3305_v30, %v2956_v49  ;;  %v2957_v47 = vmul.f32 %v3855_v52, %v2909_v16 }
0x11db   : > { %v2980_v58 = vadd.f32 %v3306_v53, %v2968_v46  ;;  %v2969_v6 = vmul.f32 %v3305_v30, %v2957_v47 }
0x11dd   : > { %v3328_v63 = vpack.c.bf16 %v2980_v58, %v2980_v58  ;;  %v2981_v61 = vadd.f32 %v3306_v53, %v2969_v6  ;;  %3023 = vst.msk [vmem:[#allocation3] sm:$0xff] (!%p3313_p6), %vm909_vm4, %v2980_v58 }
0x11df   : > { %3013 = vst.msk [vmem:[#allocation2] sm:$0xf] %vm3012_vm10, %v3328_v63  ;;  %v3329_v0 = vpack.c.bf16 %v2981_v61, %v2981_v61 }
0x11e0   : > { %3024 = vst.msk [vmem:[#allocation3 + $0x8] sm:$0xff] (!%p3313_p6), %vm909_vm4, %v2981_v61 }
0x11e1   : > { %3014 = vst.msk [vmem:[#allocation2 + $0x4] sm:$0xf] %vm3012_vm10, %v3329_v0 }
0x11f0   : > { %v2928_v2 = vpop.xlane.xlu1 %2927 }
0x11f1   : > { %v2940_v3 = vmul.f32 0.03125, %v2928_v2 }
0x11f2   : > { %v2931_v4 = vpop.xlane.xlu0 %2930 }
0x11f3   : > { %v2946_v57 = vadd.f32 1e-05, %v2940_v3  ;;  %v2941_v5 = vmul.f32 0.03125, %v2931_v4 }
0x11f5   : > { %3856 = vrsqrt.f32 %v2946_v57  ;;  %v2947_v59 = vadd.f32 1e-05, %v2941_v5 }
0x11f7   : > { %3858 = vrsqrt.f32 %v2947_v59 }
0x11f8   : > { %v2934_v9 = vpop.xlane.xlu1 %2933 }
0x11f9   : > { %v2942_v7 = vmul.f32 0.03125, %v2934_v9 }
0x11fa   : > { %v2937_v31 = vpop.xlane.xlu0 %2936 }
0x11fb   : > { %v2948_v60 = vadd.f32 1e-05, %v2942_v7  ;;  %v2943_v15 = vmul.f32 0.03125, %v2937_v31 }
0x11fd   : > { %3860 = vrsqrt.f32 %v2948_v60  ;;  %v2949_v34 = vadd.f32 1e-05, %v2943_v15 }
0x11ff   : > { %v3857_v20 = vpop.eup %3856  ;;  %3862 = vrsqrt.f32 %v2949_v34 }
0x1200   : > { %v2958_v33 = vmul.f32 %v3857_v20, %v2910_v25 }
0x1201   : > { %v3859_v21 = vpop.eup %3858 }
0x1202   : > { %v2970_v62 = vmul.f32 %v3305_v30, %v2958_v33  ;;  %v2959_v28 = vmul.f32 %v3859_v21, %v2911_v35 }
0x1204   : > { %v2982_v11 = vadd.f32 %v3306_v53, %v2970_v62  ;;  %v2971_v13 = vmul.f32 %v3305_v30, %v2959_v28 }
0x1206   : > { %v3330_v12 = vpack.c.bf16 %v2982_v11, %v2982_v11  ;;  %v2983_v14 = vadd.f32 %v3306_v53, %v2971_v13  ;;  %3025 = vst.msk [vmem:[#allocation3 + $0x10] sm:$0xff] (!%p3313_p6), %vm909_vm4, %v2982_v11 }
0x1207   : > { %v3861_v16 = vpop.eup %3860 }
0x1208   : > { %3015 = vst.msk [vmem:[#allocation2 + $0x8] sm:$0xf] %vm3012_vm10, %v3330_v12  ;;  %v3331_v17 = vpack.c.bf16 %v2983_v14, %v2983_v14  ;;  %v2960_v18 = vmul.f32 %v3861_v16, %v2912_v42 }
0x1209   : > { %v3863_v10 = vpop.eup %3862  ;;  %3026 = vst.msk [vmem:[#allocation3 + $0x18] sm:$0xff] (!%p3313_p6), %vm909_vm4, %v2983_v14 }
0x120a   : > { %3016 = vst.msk [vmem:[#allocation2 + $0xc] sm:$0xf] %vm3012_vm10, %v3331_v17  ;;  %v2972_v22 = vmul.f32 %v3305_v30, %v2960_v18  ;;  %v2961_v8 = vmul.f32 %v3863_v10, %v2913_v44 }
0x120c   : > { %v2984_v27 = vadd.f32 %v3306_v53, %v2972_v22  ;;  %v2973_v19 = vmul.f32 %v3305_v30, %v2961_v8  ;;  %3022 = sbr.rel (%p3313_p6) target bundleno = 4627 (0x1213), region = 92 }
0x120e   : > { %v3332_v25 = vpack.c.bf16 %v2984_v27, %v2984_v27  ;;  %v2985_v32 = vadd.f32 %v3306_v53, %v2973_v19  ;;  %3027 = vst.msk [vmem:[#allocation3 + $0x20] sm:$0xff] (!%p3313_p6), %vm909_vm4, %v2984_v27 }
0x1210   : > { %3017 = vst.msk [vmem:[#allocation2 + $0x10] sm:$0xf] %vm3012_vm10, %v3332_v25  ;;  %v3333_v35 = vpack.c.bf16 %v2985_v32, %v2985_v32 }
0x1211   : > { %3028 = vst.msk [vmem:[#allocation3 + $0x28] sm:$0xff] (!%p3313_p6), %vm909_vm4, %v2985_v32 }
0x1212   : > { %3018 = vst.msk [vmem:[#allocation2 + $0x14] sm:$0xf] %vm3012_vm10, %v3333_v35 }
0x1213 PF: > { %s4787_s2 = sld [smem:[#allocation7_spill]]  ;;  %s3940_s21 = smov [#allocation3]  }
0x1214   : > { %s3039_s3 = sshll.u32 %s3940_s21, 4  ;;  %s3040_s3 = int_to_ptr.vmem [resolvable:$true] %s3039_s3 }
0x1215   : > { %s3867_s30 = scalar_lea.vmem %s3040_s3, 768  ;;  %p3874_p11 = scmp.lt.s32.totalorder %s3040_s3, %s3040_s3 }
0x1216   : > { %p3868_p8 = scmp.ne.s32.totalorder %s3040_s3, %s3867_s30  ;;  %p3875_p12 = scmp.lt.s32.totalorder %s3867_s30, %s3867_s30 }
0x1218   : > { %p3876_p13 = por %p3875_p12, %p3874_p11 }
0x1219   : > { %s4788_s26 = sadd.s32 4294967295, %s4787_s2  }
0x121a   : > { %p4708_p7 = scmp.eq.s32.totalorder %s4788_s26, 1 }
0x121c   : > { %p3869_p9 = pnand %p3868_p8, %p4708_p7 }
0x121e   : > { %p3870_p10 = pneg %p3869_p9 }
0x1220   : > { %p3877_p0 = pnand %p3876_p13, %p3870_p10 }
0x1222   : > { %3880 = shalt.err (!%p3877_p0)
}
0x1223   : > { %s4790_s19 = sld [smem:[#allocation15_spill]] }
0x1229   : > { %s3881_s20 = scalar_lea.hbm %s4790_s19, 768 }
0x122a   : > { %p3882_p1 = scmp.ne.s32.totalorder %s4790_s19, %s3881_s20  ;;  %p3887_p4 = scmp.lt.u32.totalorder %s3881_s20, %s4790_s19 }
0x122c   : > { %p3883_p2 = pnand %p3882_p1, %p4708_p7 }
0x122e   : > { %p3884_p3 = pneg %p3883_p2 }
0x1230   : > { %p3889_p5 = pnand %p3887_p4, %p3884_p3 }
0x1232   : > { %3892 = shalt.err (!%p3889_p5)
}
0x1233   : > { %s3941_s22 = smov 128  }
0x1234   : > { %3673 = dma.vmem_to_hbm [thread:$0]  (%p4708_p7), %s3040_s3, 768, %s4790_s19, [#allocation4], %s3941_s22, %s3941_s22, %s3937_s29  }
0x1235   : > { %3906 = dma.done.wait (%p4708_p7), [#allocation4], 768  }
0x1236   : > { %3908 = vsyncadd (%p4708_p7), [#allocation4], 4294966528 }
0x1237 PF: > { %s4791_s2 = sld [smem:[#allocation7_spill]]  ;;  %s4792_s21 = sld [smem:[#allocation6_spill]] }
0x1238   : > { %s4793_s22 = sld [smem:[#allocation8_spill]] }
0x123d   : > { %s27_s23 = sadd.s32 1, %s4791_s2  }
0x123e   : > { %p24_p6 = scmp.ge.s32.totalorder %s27_s23, 4  }
0x1240   :  { %26 = sbr.rel (!%p24_p6) target bundleno = 9 (0x9), region = 156 }
0x1247   :  { %3055 = vsyncpa [#allocation4], 1 }
0x1248   :  { %3057 = vsyncpa [#allocation4 + $0x1], 1 }

</bundles_post_ra>
